<compile_context>
chip_gen: v6e
topology: v6e:2x2x1
jax: 0.10.0
libtpu: 0.0.40
codegen_flags: <defaults>
</compile_context>

<pallas_src>
import functools
from typing import NamedTuple

import jax
import jax.numpy as jnp
from jax.experimental import pallas as pl
from jax.experimental.pallas import tpu as pltpu


# --------------------------------------------------------------------------
# Static slab layouts (shared by prepare step and kernel)
# --------------------------------------------------------------------------
def _ceil8(n):
    return ((n + 7) // 8) * 8


def _lstm_layout(osd, oad, H2):
    """Row offsets inside the LSTM slab (cols = 4*H2)."""
    ws = 0
    wa = ws + _ceil8(osd)
    hh = wa + _ceil8(oad)
    b = hh + H2
    rows = b + 8
    return ws, wa, hh, b, rows


def _mlp_layout(sd, ad, H2, fc1, fc2):
    """Row offsets inside the MLP slab (cols = ceil128(max(fc1, fc2)))."""
    w1s = 0
    w1a = w1s + _ceil8(sd)
    w1h = w1a + _ceil8(ad)
    b1 = w1h + H2
    w2 = b1 + 8
    b2 = w2 + _ceil8(fc1)
    wq = b2 + 8
    bq = wq + 8
    rows = bq + 8
    return dict(w1s=w1s, w1a=w1a, w1h=w1h, b1=b1, w2=w2, b2=b2, wq=wq,
                bq=bq, rows=rows)


class CriticMeta(NamedTuple):
    state_dim: int
    action_dim: int
    other_state_dim: int
    other_action_dim: int
    hidden_dim: int
    hidden_pad: int
    fc1_dims: int
    fc2_dims: int


# --------------------------------------------------------------------------
# Pallas kernel: full CriticNetwork forward (fused dual-LSTM + MLP head)
# --------------------------------------------------------------------------
def _critic_kernel(state_ref, action_ref, os_ref, oa_ref, lstm_ref, mlp_ref,
                   q_ref, *, B, T, sd, ad, osd, oad, H2, fc1, fc2):
    f32 = jnp.float32
    G8 = 4 * H2            # fused gate width  [i | f | o | g], each H2 wide
    S3 = 3 * H2            # sigmoid block (i, f, o)

    l_ws, l_wa, l_hh, l_b, _ = _lstm_layout(osd, oad, H2)
    m = _mlp_layout(sd, ad, H2, fc1, fc2)

    # ---- static views into the two pre-packed parameter slabs
    w_ihx_s = lstm_ref[l_ws:l_ws + osd, :]          # (osd, G8)
    w_ihx_a = lstm_ref[l_wa:l_wa + oad, :]          # (oad, G8)
    w_hhx = lstm_ref[l_hh:l_hh + H2, :]             # (H2,  G8) block-diagonal
    b_x = lstm_ref[l_b:l_b + 1, :]                  # (1,   G8) b_ih + b_hh fused

    # ---- hoisted input projection: OFF the serial recurrence path.
    #      (B, T, D) -> (B*T, D) is a leading-dim merge (layout-free), so no
    #      wrapper-side transpose / extra HBM round trip is needed.
    os_flat = os_ref[...].astype(f32).reshape(B * T, osd)
    oa_flat = oa_ref[...].astype(f32).reshape(B * T, oad)
    zx = (jnp.dot(os_flat, w_ihx_s, preferred_element_type=f32)
          + jnp.dot(oa_flat, w_ihx_a, preferred_element_type=f32)
          + b_x)                                    # (B*T, G8), rows = b*T + t
    zx = zx.reshape(B, T, G8)

    h = jnp.zeros((B, H2), f32)                     # fused hidden [h_s | h_a]
    c = jnp.zeros((B, H2), f32)

    # ---- fused recurrence: ONE matmul + split nonlinearities per step.
    #      H2 = 128 -> every gate slice / c / h is a whole lane-aligned vreg.
    # TODO(synk): pltpu.matmul_push_rhs once + matmul_acc_lhs per step would
    #             keep w_hhx resident in the MXU across the unrolled loop.
    for t in range(T):
        z = zx[:, t, :] + jnp.dot(h, w_hhx, preferred_element_type=f32)  # (B, G8)
        sg = jax.nn.sigmoid(z[:, :S3])              # i | f | o   (3 vreg cols)
        g = jnp.tanh(z[:, S3:])                     # g           (1 vreg col)
        c = sg[:, H2:2 * H2] * c + sg[:, 0:H2] * g
        h = sg[:, 2 * H2:S3] * jnp.tanh(c)

    # h == [h_s | h_a]  (B, H2) — final hidden states of both LSTMs
    # (padded columns are exactly 0 and their fc1 rows are 0).
    state = state_ref[...].astype(f32)
    action = action_ref[...].astype(f32)

    w1_s = mlp_ref[m["w1s"]:m["w1s"] + sd, :fc1]
    w1_a = mlp_ref[m["w1a"]:m["w1a"] + ad, :fc1]
    w1_h = mlp_ref[m["w1h"]:m["w1h"] + H2, :fc1]
    b1 = mlp_ref[m["b1"]:m["b1"] + 1, :fc1]
    w2 = mlp_ref[m["w2"]:m["w2"] + fc1, :fc2]
    b2 = mlp_ref[m["b2"]:m["b2"] + 1, :fc2]
    wq = mlp_ref[m["wq"]:m["wq"] + 1, :fc2]
    bq = mlp_ref[m["bq"]:m["bq"] + 1, :1]

    # fc1 on concat([state, hs, action, ha]) as a sum of partial matmuls
    x = (jnp.dot(state, w1_s, preferred_element_type=f32)
         + jnp.dot(action, w1_a, preferred_element_type=f32)
         + jnp.dot(h, w1_h, preferred_element_type=f32)
         + b1)
    x = jnp.maximum(x, 0.0)                         # relu

    x = jnp.dot(x, w2, preferred_element_type=f32) + b2
    x = jnp.maximum(x, 0.0)                         # relu

    # q head: fc2 -> 1 as a VPU multiply + lane reduction (no N=1 MXU matmul)
    q = jnp.sum(x * wq, axis=-1, keepdims=True) + bq
    q_ref[...] = q.astype(q_ref.dtype)


# --------------------------------------------------------------------------
# Parameter construction (PyTorch-style layout + init)
# --------------------------------------------------------------------------
def make_critic_params(key, state_dim, other_state_dim, action_dim,
                       other_action_dim, hidden_dim, fc1_dims, fc2_dims):
    """Deterministic PyTorch-style uniform init for all parameters (raw layout)."""
    H = hidden_dim
    ks = jax.random.split(key, 16)

    def unif(k, shape, fan):
        bound = 1.0 / jnp.sqrt(jnp.float32(fan))
        return jax.random.uniform(k, shape, jnp.float32, -bound, bound)

    p = {}
    # slstm (input = other_state_dim); PyTorch gate row order: i, f, g, o
    p["ws_ih"] = unif(ks[0], (4 * H, other_state_dim), H)
    p["ws_hh"] = unif(ks[1], (4 * H, H), H)
    p["bs_ih"] = unif(ks[2], (4 * H,), H)
    p["bs_hh"] = unif(ks[3], (4 * H,), H)
    # alstm (input = other_action_dim)
    p["wa_ih"] = unif(ks[4], (4 * H, other_action_dim), H)
    p["wa_hh"] = unif(ks[5], (4 * H, H), H)
    p["ba_ih"] = unif(ks[6], (4 * H,), H)
    p["ba_hh"] = unif(ks[7], (4 * H,), H)
    # fc1: in = hidden + state + hidden + action (forward concat: state, hs, action, ha)
    in1 = H + state_dim + H + action_dim
    p["w1"] = unif(ks[8], (fc1_dims, in1), in1)
    p["b1"] = unif(ks[9], (fc1_dims,), in1)
    # fc2
    p["w2"] = unif(ks[10], (fc2_dims, fc1_dims), fc1_dims)
    p["b2"] = unif(ks[11], (fc2_dims,), fc1_dims)
    # q
    p["wq"] = unif(ks[12], (1, fc2_dims), fc2_dims)
    p["bq"] = unif(ks[13], (1,), fc2_dims)
    return p


def prepare_critic_params(params, *, state_dim, action_dim, hidden_dim):
    """One-time fusion / padding / packing of weights into TWO VMEM slabs.

    Fused gate-major column layout over 4*H2: [i | f | o | g], within each gate
    [s-half (H_pad cols) | a-half (H_pad cols)].  Fused hidden layout over
    H2 = 2*H_pad: [h_s | h_a].  Padded columns carry zero weights/bias, so the
    recurrence keeps them exactly 0."""
    f32 = jnp.float32
    H = hidden_dim
    Hp = -(-H // 64) * 64          # pad so H2 = 2*Hp is a multiple of 128 lanes
    H2 = 2 * Hp
    G8 = 4 * H2
    sd, ad = state_dim, action_dim

    ws_ih = jnp.asarray(params["ws_ih"], f32)       # (4H, osd), rows i|f|g|o
    ws_hh = jnp.asarray(params["ws_hh"], f32)       # (4H, H)
    wa_ih = jnp.asarray(params["wa_ih"], f32)
    wa_hh = jnp.asarray(params["wa_hh"], f32)
    bs = jnp.asarray(params["bs_ih"], f32) + jnp.asarray(params["bs_hh"], f32)
    ba = jnp.asarray(params["ba_ih"], f32) + jnp.asarray(params["ba_hh"], f32)
    osd = ws_ih.shape[1]
    oad = wa_ih.shape[1]

    w_ihx_s = jnp.zeros((osd, G8), f32)
    w_ihx_a = jnp.zeros((oad, G8), f32)
    w_hhx = jnp.zeros((H2, G8), f32)                # block-diagonal
    b_x = jnp.zeros((G8,), f32)
    # kernel gate order [i, f, o, g]; PyTorch row-block order is [i, f, g, o]
    for k, tg in enumerate((0, 1, 3, 2)):
        rows = slice(tg * H, (tg + 1) * H)
        cs = slice(k * H2, k * H2 + H)              # s-half (valid part)
        ca = slice(k * H2 + Hp, k * H2 + Hp + H)    # a-half (valid part)
        w_ihx_s = w_ihx_s.at[:, cs].set(ws_ih[rows].T)
        w_ihx_a = w_ihx_a.at[:, ca].set(wa_ih[rows].T)
        w_hhx = w_hhx.at[0:H, cs].set(ws_hh[rows].T)
        w_hhx = w_hhx.at[Hp:Hp + H, ca].set(wa_hh[rows].T)
        b_x = b_x.at[cs].set(bs[rows])
        b_x = b_x.at[ca].set(ba[rows])

    # fc1 split by concat segment [state | hs | action | ha]
    w1_t = jnp.asarray(params["w1"], f32).T         # (in1, fc1)
    fc1 = w1_t.shape[1]
    w1_state = w1_t[:sd]
    w1_hs = w1_t[sd:sd + H]
    w1_act = w1_t[sd + H:sd + H + ad]
    w1_ha = w1_t[sd + H + ad:sd + 2 * H + ad]
    w1_h = jnp.zeros((H2, fc1), f32)
    w1_h = w1_h.at[0:H].set(w1_hs).at[Hp:Hp + H].set(w1_ha)

    w2 = jnp.asarray(params["w2"], f32).T           # (fc1, fc2)
    fc2 = w2.shape[1]
    b1 = jnp.asarray(params["b1"], f32)
    b2 = jnp.asarray(params["b2"], f32)
    wq = jnp.asarray(params["wq"], f32).reshape(-1)  # (fc2,)
    bq = jnp.asarray(params["bq"], f32).reshape(-1)  # (1,)

    # ---- pack slab 1: LSTM weights (cols = G8)
    l_ws, l_wa, l_hh, l_b, l_rows = _lstm_layout(osd, oad, H2)
    lstm_slab = jnp.zeros((l_rows, G8), f32)
    lstm_slab = lstm_slab.at[l_ws:l_ws + osd].set(w_ihx_s)
    lstm_slab = lstm_slab.at[l_wa:l_wa + oad].set(w_ihx_a)
    lstm_slab = lstm_slab.at[l_hh:l_hh + H2].set(w_hhx)
    lstm_slab = lstm_slab.at[l_b].set(b_x)

    # ---- pack slab 2: MLP head (cols padded to a lane tile)
    mcols = -(-max(fc1, fc2) // 128) * 128
    m = _mlp_layout(sd, ad, H2, fc1, fc2)
    mlp_slab = jnp.zeros((m["rows"], mcols), f32)
    mlp_slab = mlp_slab.at[m["w1s"]:m["w1s"] + sd, :fc1].set(w1_state)
    mlp_slab = mlp_slab.at[m["w1a"]:m["w1a"] + ad, :fc1].set(w1_act)
    mlp_slab = mlp_slab.at[m["w1h"]:m["w1h"] + H2, :fc1].set(w1_h)
    mlp_slab = mlp_slab.at[m["b1"], :fc1].set(b1)
    mlp_slab = mlp_slab.at[m["w2"]:m["w2"] + fc1, :fc2].set(w2)
    mlp_slab = mlp_slab.at[m["b2"], :fc2].set(b2)
    mlp_slab = mlp_slab.at[m["wq"], :fc2].set(wq)
    mlp_slab = mlp_slab.at[m["bq"], 0].set(bq[0])

    slabs = {"lstm": lstm_slab, "mlp": mlp_slab}
    meta = CriticMeta(sd, ad, osd, oad, H, Hp, fc1, fc2)
    return slabs, meta


# --------------------------------------------------------------------------
# Forward wrapper: the hot path is a single pallas_call, no pre-kernel
# relayout ops (transposes / reshapes) in the wrapper at all.
# --------------------------------------------------------------------------
def make_critic_forward(meta: CriticMeta):
    sd, ad = meta.state_dim, meta.action_dim
    osd, oad = meta.other_state_dim, meta.other_action_dim
    H2 = 2 * meta.hidden_pad
    fc1, fc2 = meta.fc1_dims, meta.fc2_dims

    @jax.jit
    def forward(slabs, state, other_states, action, other_actions):
        """state (B, sd), other_states (B, T, osd),
           action (B, ad), other_actions (B, T, oad)."""
        B, T, _ = other_states.shape
        kernel = functools.partial(
            _critic_kernel, B=B, T=T, sd=sd, ad=ad, osd=osd, oad=oad,
            H2=H2, fc1=fc1, fc2=fc2)
        vmem = pl.BlockSpec(memory_space=pltpu.MemorySpace.VMEM)
        # Whole problem resident in VMEM (footprint ~0.5 MiB << 64 MiB v7x).
        # TODO(synk): if B/T grow, tile the batch via a grid + BlockSpecs and
        #             add dimension_semantics=("parallel",) for v7x megacore.
        return pl.pallas_call(
            kernel,
            out_shape=jax.ShapeDtypeStruct((B, 1), jnp.float32),
            in_specs=[vmem] * 6,
            out_specs=vmem,
        )(state.astype(jnp.float32), action.astype(jnp.float32),
          other_states.astype(jnp.float32), other_actions.astype(jnp.float32),
          slabs["lstm"], slabs["mlp"])

    return forward


# --------------------------------------------------------------------------
# Pure-JAX reference (mirrors the PyTorch forward) for correctness check
# --------------------------------------------------------------------------
def critic_forward_ref(params, state, other_states, action, other_actions,
                       hidden_dim):
    H = hidden_dim

    def lstm_last_h(xs, w_ih, w_hh, b_ih, b_hh):
        B, T, _ = xs.shape
        h = jnp.zeros((B, H), jnp.float32)
        c = jnp.zeros((B, H), jnp.float32)
        for t in range(T):
            z = xs[:, t] @ w_ih.T + b_ih + h @ w_hh.T + b_hh
            i, f, g, o = jnp.split(z, 4, axis=1)
            i, f, o = jax.nn.sigmoid(i), jax.nn.sigmoid(f), jax.nn.sigmoid(o)
            g = jnp.tanh(g)
            c = f * c + i * g
            h = o * jnp.tanh(c)
        return h

    hs = lstm_last_h(other_states, params["ws_ih"], params["ws_hh"],
                     params["bs_ih"], params["bs_hh"])
    ha = lstm_last_h(other_actions, params["wa_ih"], params["wa_hh"],
                     params["ba_ih"], params["ba_hh"])
    inputs = jnp.concatenate([state, hs, action, ha], axis=1)
    x = jax.nn.relu(inputs @ params["w1"].T + params["b1"])
    x = jax.nn.relu(x @ params["w2"].T + params["b2"])
    return x @ params["wq"].T + params["bq"]


# --------------------------------------------------------------------------
if __name__ == "__main__":
    # small, module-consistent shapes
    B = 2
    T = 8
    state_dim = 6
    other_state_dim = 5
    action_dim = 3
    other_action_dim = 4
    hidden_dim = 32
    fc1_dims = 64
    fc2_dims = 32

    root = jax.random.PRNGKey(0)
    kp, k1, k2, k3, k4 = jax.random.split(root, 5)

    params = make_critic_params(kp, state_dim, other_state_dim, action_dim,
                                other_action_dim, hidden_dim, fc1_dims, fc2_dims)
    slabs, meta = prepare_critic_params(params, state_dim=state_dim,
                                        action_dim=action_dim,
                                        hidden_dim=hidden_dim)
    forward = make_critic_forward(meta)

    state = jax.random.normal(k1, (B, state_dim), jnp.float32)
    other_states = jax.random.normal(k2, (B, T, other_state_dim), jnp.float32)
    action = jax.random.normal(k3, (B, action_dim), jnp.float32)
    other_actions = jax.random.normal(k4, (B, T, other_action_dim), jnp.float32)

    q = forward(slabs, state, other_states, action, other_actions)
    q = jax.block_until_ready(q)

    q_ref = critic_forward_ref(params, state, other_states, action,
                               other_actions, hidden_dim)
    q_ref = jax.block_until_ready(q_ref)

    assert q.shape == (B, 1)
    assert jnp.allclose(q, q_ref, atol=2e-3, rtol=2e-3), (q, q_ref)
    print("KERNEL_OK")
</pallas_src>

<mosaic_0001>
module attributes {stable_mosaic.version = 11 : i64} {
  func.func @_critic_kernel(%arg0: memref<2x6xf32, #tpu.memory_space<vmem>>, %arg1: memref<2x3xf32, #tpu.memory_space<vmem>>, %arg2: memref<2x8x5xf32, #tpu.memory_space<vmem>>, %arg3: memref<2x8x4xf32, #tpu.memory_space<vmem>>, %arg4: memref<152x512xf32, #tpu.memory_space<vmem>>, %arg5: memref<240x128xf32, #tpu.memory_space<vmem>>, %arg6: memref<2x1xf32, #tpu.memory_space<vmem>>) attributes {dimension_semantics = [], scalar_prefetch = 0 : i64, scratch_operands = 0 : i64, tpu.core_type = #tpu.core_type<tc>} {
    %c0 = arith.constant 0 : index
    %c0_0 = arith.constant 0 : index
    %0 = vector.load %arg4[%c0, %c0_0] : memref<152x512xf32, #tpu.memory_space<vmem>>, vector<5x512xf32>
    %c8 = arith.constant 8 : index
    %c0_1 = arith.constant 0 : index
    %1 = vector.load %arg4[%c8, %c0_1] : memref<152x512xf32, #tpu.memory_space<vmem>>, vector<4x512xf32>
    %c16 = arith.constant 16 : index
    %c0_2 = arith.constant 0 : index
    %2 = vector.load %arg4[%c16, %c0_2] : memref<152x512xf32, #tpu.memory_space<vmem>>, vector<128x512xf32>
    %c144 = arith.constant 144 : index
    %c0_3 = arith.constant 0 : index
    %3 = vector.load %arg4[%c144, %c0_3] : memref<152x512xf32, #tpu.memory_space<vmem>>, vector<1x512xf32>
    %c0_4 = arith.constant 0 : index
    %c0_5 = arith.constant 0 : index
    %c0_6 = arith.constant 0 : index
    %4 = vector.load %arg2[%c0_4, %c0_5, %c0_6] : memref<2x8x5xf32, #tpu.memory_space<vmem>>, vector<2x8x5xf32>
    %5 = vector.shape_cast %4 : vector<2x8x5xf32> to vector<16x5xf32>
    %c0_7 = arith.constant 0 : index
    %c0_8 = arith.constant 0 : index
    %c0_9 = arith.constant 0 : index
    %6 = vector.load %arg3[%c0_7, %c0_8, %c0_9] : memref<2x8x4xf32, #tpu.memory_space<vmem>>, vector<2x8x4xf32>
    %7 = vector.shape_cast %6 : vector<2x8x4xf32> to vector<16x4xf32>
    %cst = arith.constant dense<0.000000e+00> : vector<16x512xf32>
    %8 = tpu.matmul %5, %0, %cst {dimension_numbers = #tpu.dot_dimension_numbers<[1], [0], [0], [1], [0, 0, 1, 1], [], []>} : vector<16x5xf32>, vector<5x512xf32>, vector<16x512xf32> -> vector<16x512xf32>
    %cst_10 = arith.constant dense<0.000000e+00> : vector<16x512xf32>
    %9 = tpu.matmul %7, %1, %cst_10 {dimension_numbers = #tpu.dot_dimension_numbers<[1], [0], [0], [1], [0, 0, 1, 1], [], []>} : vector<16x4xf32>, vector<4x512xf32>, vector<16x512xf32> -> vector<16x512xf32>
    %10 = arith.addf %8, %9 : vector<16x512xf32>
    %11 = vector.broadcast %3 : vector<1x512xf32> to vector<16x512xf32>
    %12 = arith.addf %10, %11 : vector<16x512xf32>
    %13 = vector.shape_cast %12 : vector<16x512xf32> to vector<2x8x512xf32>
    %cst_11 = arith.constant 0.000000e+00 : f32
    %14 = vector.broadcast %cst_11 : f32 to vector<2x128xf32>
    %cst_12 = arith.constant 0.000000e+00 : f32
    %15 = vector.broadcast %cst_12 : f32 to vector<2x128xf32>
    %16 = vector.extract_strided_slice %13 {offsets = [0, 0, 0], sizes = [2, 1, 512], strides = [1, 1, 1]} : vector<2x8x512xf32> to vector<2x1x512xf32>
    %17 = vector.shape_cast %16 : vector<2x1x512xf32> to vector<2x512xf32>
    %cst_13 = arith.constant dense<0.000000e+00> : vector<2x512xf32>
    %18 = tpu.matmul %14, %2, %cst_13 {dimension_numbers = #tpu.dot_dimension_numbers<[1], [0], [0], [1], [0, 0, 1, 1], [], []>} : vector<2x128xf32>, vector<128x512xf32>, vector<2x512xf32> -> vector<2x512xf32>
    %19 = arith.addf %17, %18 : vector<2x512xf32>
    %20 = vector.extract_strided_slice %19 {offsets = [0, 0], sizes = [2, 384], strides = [1, 1]} : vector<2x512xf32> to vector<2x384xf32>
    %21 = arith.negf %20 : vector<2x384xf32>
    %22 = math.exp %21 : vector<2x384xf32>
    %cst_14 = arith.constant 1.000000e+00 : f32
    %23 = vector.broadcast %cst_14 : f32 to vector<2x384xf32>
    %24 = arith.addf %23, %22 : vector<2x384xf32>
    %25 = arith.divf %23, %24 : vector<2x384xf32>
    %26 = vector.extract_strided_slice %19 {offsets = [0, 384], sizes = [2, 128], strides = [1, 1]} : vector<2x512xf32> to vector<2x128xf32>
    %27 = math.tanh %26 : vector<2x128xf32>
    %28 = vector.extract_strided_slice %25 {offsets = [0, 128], sizes = [2, 128], strides = [1, 1]} : vector<2x384xf32> to vector<2x128xf32>
    %29 = arith.mulf %28, %15 : vector<2x128xf32>
    %30 = vector.extract_strided_slice %25 {offsets = [0, 0], sizes = [2, 128], strides = [1, 1]} : vector<2x384xf32> to vector<2x128xf32>
    %31 = arith.mulf %30, %27 : vector<2x128xf32>
    %32 = arith.addf %29, %31 : vector<2x128xf32>
    %33 = vector.extract_strided_slice %25 {offsets = [0, 256], sizes = [2, 128], strides = [1, 1]} : vector<2x384xf32> to vector<2x128xf32>
    %34 = math.tanh %32 : vector<2x128xf32>
    %35 = arith.mulf %33, %34 : vector<2x128xf32>
    %36 = vector.extract_strided_slice %13 {offsets = [0, 1, 0], sizes = [2, 1, 512], strides = [1, 1, 1]} : vector<2x8x512xf32> to vector<2x1x512xf32>
    %37 = vector.shape_cast %36 : vector<2x1x512xf32> to vector<2x512xf32>
    %cst_15 = arith.constant dense<0.000000e+00> : vector<2x512xf32>
    %38 = tpu.matmul %35, %2, %cst_15 {dimension_numbers = #tpu.dot_dimension_numbers<[1], [0], [0], [1], [0, 0, 1, 1], [], []>} : vector<2x128xf32>, vector<128x512xf32>, vector<2x512xf32> -> vector<2x512xf32>
    %39 = arith.addf %37, %38 : vector<2x512xf32>
    %40 = vector.extract_strided_slice %39 {offsets = [0, 0], sizes = [2, 384], strides = [1, 1]} : vector<2x512xf32> to vector<2x384xf32>
    %41 = arith.negf %40 : vector<2x384xf32>
    %42 = math.exp %41 : vector<2x384xf32>
    %cst_16 = arith.constant 1.000000e+00 : f32
    %43 = vector.broadcast %cst_16 : f32 to vector<2x384xf32>
    %44 = arith.addf %43, %42 : vector<2x384xf32>
    %45 = arith.divf %43, %44 : vector<2x384xf32>
    %46 = vector.extract_strided_slice %39 {offsets = [0, 384], sizes = [2, 128], strides = [1, 1]} : vector<2x512xf32> to vector<2x128xf32>
    %47 = math.tanh %46 : vector<2x128xf32>
    %48 = vector.extract_strided_slice %45 {offsets = [0, 128], sizes = [2, 128], strides = [1, 1]} : vector<2x384xf32> to vector<2x128xf32>
    %49 = arith.mulf %48, %32 : vector<2x128xf32>
    %50 = vector.extract_strided_slice %45 {offsets = [0, 0], sizes = [2, 128], strides = [1, 1]} : vector<2x384xf32> to vector<2x128xf32>
    %51 = arith.mulf %50, %47 : vector<2x128xf32>
    %52 = arith.addf %49, %51 : vector<2x128xf32>
    %53 = vector.extract_strided_slice %45 {offsets = [0, 256], sizes = [2, 128], strides = [1, 1]} : vector<2x384xf32> to vector<2x128xf32>
    %54 = math.tanh %52 : vector<2x128xf32>
    %55 = arith.mulf %53, %54 : vector<2x128xf32>
    %56 = vector.extract_strided_slice %13 {offsets = [0, 2, 0], sizes = [2, 1, 512], strides = [1, 1, 1]} : vector<2x8x512xf32> to vector<2x1x512xf32>
    %57 = vector.shape_cast %56 : vector<2x1x512xf32> to vector<2x512xf32>
    %cst_17 = arith.constant dense<0.000000e+00> : vector<2x512xf32>
    %58 = tpu.matmul %55, %2, %cst_17 {dimension_numbers = #tpu.dot_dimension_numbers<[1], [0], [0], [1], [0, 0, 1, 1], [], []>} : vector<2x128xf32>, vector<128x512xf32>, vector<2x512xf32> -> vector<2x512xf32>
    %59 = arith.addf %57, %58 : vector<2x512xf32>
    %60 = vector.extract_strided_slice %59 {offsets = [0, 0], sizes = [2, 384], strides = [1, 1]} : vector<2x512xf32> to vector<2x384xf32>
    %61 = arith.negf %60 : vector<2x384xf32>
    %62 = math.exp %61 : vector<2x384xf32>
    %cst_18 = arith.constant 1.000000e+00 : f32
    %63 = vector.broadcast %cst_18 : f32 to vector<2x384xf32>
    %64 = arith.addf %63, %62 : vector<2x384xf32>
    %65 = arith.divf %63, %64 : vector<2x384xf32>
    %66 = vector.extract_strided_slice %59 {offsets = [0, 384], sizes = [2, 128], strides = [1, 1]} : vector<2x512xf32> to vector<2x128xf32>
    %67 = math.tanh %66 : vector<2x128xf32>
    %68 = vector.extract_strided_slice %65 {offsets = [0, 128], sizes = [2, 128], strides = [1, 1]} : vector<2x384xf32> to vector<2x128xf32>
    %69 = arith.mulf %68, %52 : vector<2x128xf32>
    %70 = vector.extract_strided_slice %65 {offsets = [0, 0], sizes = [2, 128], strides = [1, 1]} : vector<2x384xf32> to vector<2x128xf32>
    %71 = arith.mulf %70, %67 : vector<2x128xf32>
    %72 = arith.addf %69, %71 : vector<2x128xf32>
    %73 = vector.extract_strided_slice %65 {offsets = [0, 256], sizes = [2, 128], strides = [1, 1]} : vector<2x384xf32> to vector<2x128xf32>
    %74 = math.tanh %72 : vector<2x128xf32>
    %75 = arith.mulf %73, %74 : vector<2x128xf32>
    %76 = vector.extract_strided_slice %13 {offsets = [0, 3, 0], sizes = [2, 1, 512], strides = [1, 1, 1]} : vector<2x8x512xf32> to vector<2x1x512xf32>
    %77 = vector.shape_cast %76 : vector<2x1x512xf32> to vector<2x512xf32>
    %cst_19 = arith.constant dense<0.000000e+00> : vector<2x512xf32>
    %78 = tpu.matmul %75, %2, %cst_19 {dimension_numbers = #tpu.dot_dimension_numbers<[1], [0], [0], [1], [0, 0, 1, 1], [], []>} : vector<2x128xf32>, vector<128x512xf32>, vector<2x512xf32> -> vector<2x512xf32>
    %79 = arith.addf %77, %78 : vector<2x512xf32>
    %80 = vector.extract_strided_slice %79 {offsets = [0, 0], sizes = [2, 384], strides = [1, 1]} : vector<2x512xf32> to vector<2x384xf32>
    %81 = arith.negf %80 : vector<2x384xf32>
    %82 = math.exp %81 : vector<2x384xf32>
    %cst_20 = arith.constant 1.000000e+00 : f32
    %83 = vector.broadcast %cst_20 : f32 to vector<2x384xf32>
    %84 = arith.addf %83, %82 : vector<2x384xf32>
    %85 = arith.divf %83, %84 : vector<2x384xf32>
    %86 = vector.extract_strided_slice %79 {offsets = [0, 384], sizes = [2, 128], strides = [1, 1]} : vector<2x512xf32> to vector<2x128xf32>
    %87 = math.tanh %86 : vector<2x128xf32>
    %88 = vector.extract_strided_slice %85 {offsets = [0, 128], sizes = [2, 128], strides = [1, 1]} : vector<2x384xf32> to vector<2x128xf32>
    %89 = arith.mulf %88, %72 : vector<2x128xf32>
    %90 = vector.extract_strided_slice %85 {offsets = [0, 0], sizes = [2, 128], strides = [1, 1]} : vector<2x384xf32> to vector<2x128xf32>
    %91 = arith.mulf %90, %87 : vector<2x128xf32>
    %92 = arith.addf %89, %91 : vector<2x128xf32>
    %93 = vector.extract_strided_slice %85 {offsets = [0, 256], sizes = [2, 128], strides = [1, 1]} : vector<2x384xf32> to vector<2x128xf32>
    %94 = math.tanh %92 : vector<2x128xf32>
    %95 = arith.mulf %93, %94 : vector<2x128xf32>
    %96 = vector.extract_strided_slice %13 {offsets = [0, 4, 0], sizes = [2, 1, 512], strides = [1, 1, 1]} : vector<2x8x512xf32> to vector<2x1x512xf32>
    %97 = vector.shape_cast %96 : vector<2x1x512xf32> to vector<2x512xf32>
    %cst_21 = arith.constant dense<0.000000e+00> : vector<2x512xf32>
    %98 = tpu.matmul %95, %2, %cst_21 {dimension_numbers = #tpu.dot_dimension_numbers<[1], [0], [0], [1], [0, 0, 1, 1], [], []>} : vector<2x128xf32>, vector<128x512xf32>, vector<2x512xf32> -> vector<2x512xf32>
    %99 = arith.addf %97, %98 : vector<2x512xf32>
    %100 = vector.extract_strided_slice %99 {offsets = [0, 0], sizes = [2, 384], strides = [1, 1]} : vector<2x512xf32> to vector<2x384xf32>
    %101 = arith.negf %100 : vector<2x384xf32>
    %102 = math.exp %101 : vector<2x384xf32>
    %cst_22 = arith.constant 1.000000e+00 : f32
    %103 = vector.broadcast %cst_22 : f32 to vector<2x384xf32>
    %104 = arith.addf %103, %102 : vector<2x384xf32>
    %105 = arith.divf %103, %104 : vector<2x384xf32>
    %106 = vector.extract_strided_slice %99 {offsets = [0, 384], sizes = [2, 128], strides = [1, 1]} : vector<2x512xf32> to vector<2x128xf32>
    %107 = math.tanh %106 : vector<2x128xf32>
    %108 = vector.extract_strided_slice %105 {offsets = [0, 128], sizes = [2, 128], strides = [1, 1]} : vector<2x384xf32> to vector<2x128xf32>
    %109 = arith.mulf %108, %92 : vector<2x128xf32>
    %110 = vector.extract_strided_slice %105 {offsets = [0, 0], sizes = [2, 128], strides = [1, 1]} : vector<2x384xf32> to vector<2x128xf32>
    %111 = arith.mulf %110, %107 : vector<2x128xf32>
    %112 = arith.addf %109, %111 : vector<2x128xf32>
    %113 = vector.extract_strided_slice %105 {offsets = [0, 256], sizes = [2, 128], strides = [1, 1]} : vector<2x384xf32> to vector<2x128xf32>
    %114 = math.tanh %112 : vector<2x128xf32>
    %115 = arith.mulf %113, %114 : vector<2x128xf32>
    %116 = vector.extract_strided_slice %13 {offsets = [0, 5, 0], sizes = [2, 1, 512], strides = [1, 1, 1]} : vector<2x8x512xf32> to vector<2x1x512xf32>
    %117 = vector.shape_cast %116 : vector<2x1x512xf32> to vector<2x512xf32>
    %cst_23 = arith.constant dense<0.000000e+00> : vector<2x512xf32>
    %118 = tpu.matmul %115, %2, %cst_23 {dimension_numbers = #tpu.dot_dimension_numbers<[1], [0], [0], [1], [0, 0, 1, 1], [], []>} : vector<2x128xf32>, vector<128x512xf32>, vector<2x512xf32> -> vector<2x512xf32>
    %119 = arith.addf %117, %118 : vector<2x512xf32>
    %120 = vector.extract_strided_slice %119 {offsets = [0, 0], sizes = [2, 384], strides = [1, 1]} : vector<2x512xf32> to vector<2x384xf32>
    %121 = arith.negf %120 : vector<2x384xf32>
    %122 = math.exp %121 : vector<2x384xf32>
    %cst_24 = arith.constant 1.000000e+00 : f32
    %123 = vector.broadcast %cst_24 : f32 to vector<2x384xf32>
    %124 = arith.addf %123, %122 : vector<2x384xf32>
    %125 = arith.divf %123, %124 : vector<2x384xf32>
    %126 = vector.extract_strided_slice %119 {offsets = [0, 384], sizes = [2, 128], strides = [1, 1]} : vector<2x512xf32> to vector<2x128xf32>
    %127 = math.tanh %126 : vector<2x128xf32>
    %128 = vector.extract_strided_slice %125 {offsets = [0, 128], sizes = [2, 128], strides = [1, 1]} : vector<2x384xf32> to vector<2x128xf32>
    %129 = arith.mulf %128, %112 : vector<2x128xf32>
    %130 = vector.extract_strided_slice %125 {offsets = [0, 0], sizes = [2, 128], strides = [1, 1]} : vector<2x384xf32> to vector<2x128xf32>
    %131 = arith.mulf %130, %127 : vector<2x128xf32>
    %132 = arith.addf %129, %131 : vector<2x128xf32>
    %133 = vector.extract_strided_slice %125 {offsets = [0, 256], sizes = [2, 128], strides = [1, 1]} : vector<2x384xf32> to vector<2x128xf32>
    %134 = math.tanh %132 : vector<2x128xf32>
    %135 = arith.mulf %133, %134 : vector<2x128xf32>
    %136 = vector.extract_strided_slice %13 {offsets = [0, 6, 0], sizes = [2, 1, 512], strides = [1, 1, 1]} : vector<2x8x512xf32> to vector<2x1x512xf32>
    %137 = vector.shape_cast %136 : vector<2x1x512xf32> to vector<2x512xf32>
    %cst_25 = arith.constant dense<0.000000e+00> : vector<2x512xf32>
    %138 = tpu.matmul %135, %2, %cst_25 {dimension_numbers = #tpu.dot_dimension_numbers<[1], [0], [0], [1], [0, 0, 1, 1], [], []>} : vector<2x128xf32>, vector<128x512xf32>, vector<2x512xf32> -> vector<2x512xf32>
    %139 = arith.addf %137, %138 : vector<2x512xf32>
    %140 = vector.extract_strided_slice %139 {offsets = [0, 0], sizes = [2, 384], strides = [1, 1]} : vector<2x512xf32> to vector<2x384xf32>
    %141 = arith.negf %140 : vector<2x384xf32>
    %142 = math.exp %141 : vector<2x384xf32>
    %cst_26 = arith.constant 1.000000e+00 : f32
    %143 = vector.broadcast %cst_26 : f32 to vector<2x384xf32>
    %144 = arith.addf %143, %142 : vector<2x384xf32>
    %145 = arith.divf %143, %144 : vector<2x384xf32>
    %146 = vector.extract_strided_slice %139 {offsets = [0, 384], sizes = [2, 128], strides = [1, 1]} : vector<2x512xf32> to vector<2x128xf32>
    %147 = math.tanh %146 : vector<2x128xf32>
    %148 = vector.extract_strided_slice %145 {offsets = [0, 128], sizes = [2, 128], strides = [1, 1]} : vector<2x384xf32> to vector<2x128xf32>
    %149 = arith.mulf %148, %132 : vector<2x128xf32>
    %150 = vector.extract_strided_slice %145 {offsets = [0, 0], sizes = [2, 128], strides = [1, 1]} : vector<2x384xf32> to vector<2x128xf32>
    %151 = arith.mulf %150, %147 : vector<2x128xf32>
    %152 = arith.addf %149, %151 : vector<2x128xf32>
    %153 = vector.extract_strided_slice %145 {offsets = [0, 256], sizes = [2, 128], strides = [1, 1]} : vector<2x384xf32> to vector<2x128xf32>
    %154 = math.tanh %152 : vector<2x128xf32>
    %155 = arith.mulf %153, %154 : vector<2x128xf32>
    %156 = vector.extract_strided_slice %13 {offsets = [0, 7, 0], sizes = [2, 1, 512], strides = [1, 1, 1]} : vector<2x8x512xf32> to vector<2x1x512xf32>
    %157 = vector.shape_cast %156 : vector<2x1x512xf32> to vector<2x512xf32>
    %cst_27 = arith.constant dense<0.000000e+00> : vector<2x512xf32>
    %158 = tpu.matmul %155, %2, %cst_27 {dimension_numbers = #tpu.dot_dimension_numbers<[1], [0], [0], [1], [0, 0, 1, 1], [], []>} : vector<2x128xf32>, vector<128x512xf32>, vector<2x512xf32> -> vector<2x512xf32>
    %159 = arith.addf %157, %158 : vector<2x512xf32>
    %160 = vector.extract_strided_slice %159 {offsets = [0, 0], sizes = [2, 384], strides = [1, 1]} : vector<2x512xf32> to vector<2x384xf32>
    %161 = arith.negf %160 : vector<2x384xf32>
    %162 = math.exp %161 : vector<2x384xf32>
    %cst_28 = arith.constant 1.000000e+00 : f32
    %163 = vector.broadcast %cst_28 : f32 to vector<2x384xf32>
    %164 = arith.addf %163, %162 : vector<2x384xf32>
    %165 = arith.divf %163, %164 : vector<2x384xf32>
    %166 = vector.extract_strided_slice %159 {offsets = [0, 384], sizes = [2, 128], strides = [1, 1]} : vector<2x512xf32> to vector<2x128xf32>
    %167 = math.tanh %166 : vector<2x128xf32>
    %168 = vector.extract_strided_slice %165 {offsets = [0, 128], sizes = [2, 128], strides = [1, 1]} : vector<2x384xf32> to vector<2x128xf32>
    %169 = arith.mulf %168, %152 : vector<2x128xf32>
    %170 = vector.extract_strided_slice %165 {offsets = [0, 0], sizes = [2, 128], strides = [1, 1]} : vector<2x384xf32> to vector<2x128xf32>
    %171 = arith.mulf %170, %167 : vector<2x128xf32>
    %172 = arith.addf %169, %171 : vector<2x128xf32>
    %173 = vector.extract_strided_slice %165 {offsets = [0, 256], sizes = [2, 128], strides = [1, 1]} : vector<2x384xf32> to vector<2x128xf32>
    %174 = math.tanh %172 : vector<2x128xf32>
    %175 = arith.mulf %173, %174 : vector<2x128xf32>
    %c0_29 = arith.constant 0 : index
    %c0_30 = arith.constant 0 : index
    %176 = vector.load %arg0[%c0_29, %c0_30] : memref<2x6xf32, #tpu.memory_space<vmem>>, vector<2x6xf32>
    %c0_31 = arith.constant 0 : index
    %c0_32 = arith.constant 0 : index
    %177 = vector.load %arg1[%c0_31, %c0_32] : memref<2x3xf32, #tpu.memory_space<vmem>>, vector<2x3xf32>
    %c0_33 = arith.constant 0 : index
    %c0_34 = arith.constant 0 : index
    %178 = vector.load %arg5[%c0_33, %c0_34] : memref<240x128xf32, #tpu.memory_space<vmem>>, vector<6x64xf32>
    %c8_35 = arith.constant 8 : index
    %c0_36 = arith.constant 0 : index
    %179 = vector.load %arg5[%c8_35, %c0_36] : memref<240x128xf32, #tpu.memory_space<vmem>>, vector<3x64xf32>
    %c16_37 = arith.constant 16 : index
    %c0_38 = arith.constant 0 : index
    %180 = vector.load %arg5[%c16_37, %c0_38] : memref<240x128xf32, #tpu.memory_space<vmem>>, vector<128x64xf32>
    %c144_39 = arith.constant 144 : index
    %c0_40 = arith.constant 0 : index
    %181 = vector.load %arg5[%c144_39, %c0_40] : memref<240x128xf32, #tpu.memory_space<vmem>>, vector<1x64xf32>
    %c152 = arith.constant 152 : index
    %c0_41 = arith.constant 0 : index
    %182 = vector.load %arg5[%c152, %c0_41] : memref<240x128xf32, #tpu.memory_space<vmem>>, vector<64x32xf32>
    %c216 = arith.constant 216 : index
    %c0_42 = arith.constant 0 : index
    %183 = vector.load %arg5[%c216, %c0_42] : memref<240x128xf32, #tpu.memory_space<vmem>>, vector<1x32xf32>
    %c224 = arith.constant 224 : index
    %c0_43 = arith.constant 0 : index
    %184 = vector.load %arg5[%c224, %c0_43] : memref<240x128xf32, #tpu.memory_space<vmem>>, vector<1x32xf32>
    %c232 = arith.constant 232 : index
    %c0_44 = arith.constant 0 : index
    %185 = vector.load %arg5[%c232, %c0_44] : memref<240x128xf32, #tpu.memory_space<vmem>>, vector<1x1xf32>
    %cst_45 = arith.constant dense<0.000000e+00> : vector<2x64xf32>
    %186 = tpu.matmul %176, %178, %cst_45 {dimension_numbers = #tpu.dot_dimension_numbers<[1], [0], [0], [1], [0, 0, 1, 1], [], []>} : vector<2x6xf32>, vector<6x64xf32>, vector<2x64xf32> -> vector<2x64xf32>
    %cst_46 = arith.constant dense<0.000000e+00> : vector<2x64xf32>
    %187 = tpu.matmul %177, %179, %cst_46 {dimension_numbers = #tpu.dot_dimension_numbers<[1], [0], [0], [1], [0, 0, 1, 1], [], []>} : vector<2x3xf32>, vector<3x64xf32>, vector<2x64xf32> -> vector<2x64xf32>
    %188 = arith.addf %186, %187 : vector<2x64xf32>
    %cst_47 = arith.constant dense<0.000000e+00> : vector<2x64xf32>
    %189 = tpu.matmul %175, %180, %cst_47 {dimension_numbers = #tpu.dot_dimension_numbers<[1], [0], [0], [1], [0, 0, 1, 1], [], []>} : vector<2x128xf32>, vector<128x64xf32>, vector<2x64xf32> -> vector<2x64xf32>
    %190 = arith.addf %188, %189 : vector<2x64xf32>
    %191 = vector.broadcast %181 : vector<1x64xf32> to vector<2x64xf32>
    %192 = arith.addf %190, %191 : vector<2x64xf32>
    %cst_48 = arith.constant 0.000000e+00 : f32
    %193 = vector.broadcast %cst_48 : f32 to vector<2x64xf32>
    %194 = arith.maximumf %192, %193 : vector<2x64xf32>
    %cst_49 = arith.constant dense<0.000000e+00> : vector<2x32xf32>
    %195 = tpu.matmul %194, %182, %cst_49 {dimension_numbers = #tpu.dot_dimension_numbers<[1], [0], [0], [1], [0, 0, 1, 1], [], []>} : vector<2x64xf32>, vector<64x32xf32>, vector<2x32xf32> -> vector<2x32xf32>
    %196 = vector.broadcast %183 : vector<1x32xf32> to vector<2x32xf32>
    %197 = arith.addf %195, %196 : vector<2x32xf32>
    %cst_50 = arith.constant 0.000000e+00 : f32
    %198 = vector.broadcast %cst_50 : f32 to vector<2x32xf32>
    %199 = arith.maximumf %197, %198 : vector<2x32xf32>
    %200 = vector.broadcast %184 : vector<1x32xf32> to vector<2x32xf32>
    %201 = arith.mulf %199, %200 : vector<2x32xf32>
    %cst_51 = arith.constant dense<0.000000e+00> : vector<2xf32>
    %202 = vector.multi_reduction <add>, %201, %cst_51 [1] : vector<2x32xf32> to vector<2xf32>
    %203 = vector.shape_cast %202 : vector<2xf32> to vector<2x1xf32>
    %204 = vector.broadcast %185 : vector<1x1xf32> to vector<2x1xf32>
    %205 = arith.addf %203, %204 : vector<2x1xf32>
    %c0_52 = arith.constant 0 : index
    %c0_53 = arith.constant 0 : index
    %206 = vector.load %arg6[%c0_52, %c0_53] : memref<2x1xf32, #tpu.memory_space<vmem>>, vector<2x1xf32>
    tpu.vector_store %arg6[%c0_52, %c0_53], %205 {strides = array<i32>} : memref<2x1xf32, #tpu.memory_space<vmem>>, vector<2x1xf32>,
    return
  }
}

</mosaic_0001>

<bundles_post_ra>
// kernel: forward.1
= control target key start
LH: loop header
LB: loop body
LE: loop exit
PB: predicated region body
PF: predicated region fallthrough
CT: control target
= control target key end

     0   :  { %11 = vsyncpa [#allocation3], 0  ;;  %s4298_s0 = inlined_call_operand.vmem [shape: f32[2,6], index: 0, kind: input, shape index: {}]   ;;  %s4299_s1 = inlined_call_operand.vmem [shape: f32[2,3], index: 1, kind: input, shape index: {}]   ;;  %s4300_s2 = inlined_call_operand.vmem [shape: f32[2,8,5], index: 2, kind: input, shape index: {}]   ;;  %s4301_s3 = inlined_call_operand.vmem [shape: f32[2,8,4], index: 3, kind: input, shape index: {}]   ;;  %s4302_s4 = inlined_call_operand.hbm [shape: f32[152,512], index: 4, kind: input, shape index: {}]   ;;  %s4303_s5 = inlined_call_operand.hbm [shape: f32[240,128], index: 5, kind: input, shape index: {}]   ;;  %s4304_s6 = inlined_call_operand.vmem [shape: f32[2,1], index: 6, kind: output, shape index: {}]  }
   0x1   :  { %12 = vsyncpa [#allocation5], 0  ;;  %s3236_s21 = smov [#allocation2]  }
   0x2   :  { %s26_s22 = sshll.u32 %s3236_s21, 4  ;;  %s27_s22 = int_to_ptr.vmem [resolvable:$true] %s26_s22 }
   0x3   :  { %s3200_s23 = scalar_lea.vmem %s27_s22, 9728  ;;  %p3205_p1 = scmp.lt.s32.totalorder %s27_s22, %s27_s22 }
   0x4   :  { %p3201_p0 = scmp.ne.s32.totalorder %s27_s22, %s3200_s23  ;;  %p3206_p2 = scmp.lt.s32.totalorder %s3200_s23, %s3200_s23 }
   0x6   :  { %p3207_p3 = por %p3206_p2, %p3205_p1 }
   0x8   :  { %p3208_p4 = pnand %p3207_p3, %p3201_p0 }
   0xa   :  { %3211 = shalt.err (!%p3208_p4)
}
   0xb   :  { %s3237_s24 = smov 512   ;;  %s3238_s25 = smov 32  }
   0xc   :  { %32 = dma.hbm_to_vmem [thread:$0]  %s4302_s4, 9728, %s27_s22, [#allocation3], %s3237_s24, %s3237_s24, %s3238_s25  }
   0xd   :  { %s3239_s28 = smov [#allocation4]  }
   0xe   :  { %s38_s29 = sshll.u32 %s3239_s28, 4  ;;  %s39_s29 = int_to_ptr.vmem [resolvable:$true] %s38_s29 }
   0xf   :  { %s3220_s30 = scalar_lea.vmem %s39_s29, 3840  ;;  %p3225_p6 = scmp.lt.s32.totalorder %s39_s29, %s39_s29 }
  0x10   :  { %p3221_p5 = scmp.ne.s32.totalorder %s39_s29, %s3220_s30  ;;  %p3226_p7 = scmp.lt.s32.totalorder %s3220_s30, %s3220_s30 }
  0x12   :  { %p3227_p8 = por %p3226_p7, %p3225_p6 }
  0x14   :  { %p3228_p9 = pnand %p3227_p8, %p3221_p5 }
  0x16   :  { %3231 = shalt.err (!%p3228_p9)
}
  0x17   :  { %s3240_s7 = smov 128   ;;  %s3241_s8 = smov 8  }
  0x18   :  { %44 = dma.hbm_to_vmem [thread:$0]  %s4303_s5, 3840, %s39_s29, [#allocation5], %s3240_s7, %s3240_s7, %s3241_s8  }
  0x19   :  { %3232 = dma.done.wait [#allocation3], 9728  }
  0x1a   :  { %3233 = vsyncadd [#allocation3], 4294957568 }
  0x1b   :  { %3234 = dma.done.wait [#allocation5], 3840  }
  0x1c   :  { %3235 = vsyncadd [#allocation5], 4294963456  ;;  %v4305_v0 = vmov 0.0   ;;  %vm136_vm0 = vcmask 1043456   ;;  %vm310_vm1 = vcmask 1044480   ;;  %vm129_vm2 = vcmask 31744  }
  0x1d   :  { %213 = vmatprep.mubr.f32.mxu1 %v4305_v0  ;;  %387 = vmatprep.mubr.f32.mxu0 %v4305_v0  ;;  %vm303_vm3 = vcmask 39936   ;;  %v56_v1 = vld [vmem:[#allocation2 + $0x28] sm:$0xf]  ;;  %v55_v3 = vld [vmem:[#allocation2 + $0x20] sm:$0xf]  ;;  %v3344_v23 = vld [vmem:[#allocation2 + $0x238] sm:$0xff] }
  0x1e   :  { %v52_v2 = vld [vmem:[#allocation2 + $0x8] sm:$0x1f]  ;;  %2697 = vmatprep.subr.msk.mxu1 %vm136_vm0, %v56_v1  ;;  %v51_v4 = vld [vmem:[#allocation2] sm:$0x1f]  ;;  %v58_v9 = vld [vmem:[#allocation2 + $0x38] sm:$0xf] }
  0x1f   :  { %2705 = vmatprep.subr.msk.mxu0 %vm310_vm1, %v52_v2  ;;  %v127_v5 = vld [vmem:[%s4301_s3] sm:$0xff]  ;;  %2698 = vmatpush1.msk.msra.mxu1 %vm136_vm0, %v55_v3  ;;  %v3297_v7 = vld [vmem:[#allocation2 + $0x228] sm:$0xff]  ;;  %v57_v11 = vld [vmem:[#allocation2 + $0x30] sm:$0xf]  ;;  %4441 = vst [vmem:[#allocation10_spill] sm:$0xff] %v3344_v23  ;;  %vm723_vm4 = vcmask 1041409  }
  0x20   :  { %v125_v6 = vld [vmem:[%s4300_s2] sm:$0xff]  ;;  %2706 = vmatpush1.msk.msra.mxu0 %vm310_vm1, %v51_v4  ;;  %4439 = vst [vmem:[#allocation8_spill] sm:$0xff] %v3297_v7  ;;  %2699 = vmatmul.mubr.msk.f32.vlgmr.msra.gmra.mxu1 %vm129_vm2, %v127_v5  ;;  %v3303_v10 = vld [vmem:[#allocation2 + $0x208] sm:$0xff]  ;;  %v54_v17 = vld [vmem:[#allocation2 + $0x18] sm:$0x1f]  ;;  %vm2361_vm5 = vcmask 1042432  }
  0x21   :  { %v3299_v8 = vld [vmem:[#allocation2 + $0x220] sm:$0xff]  ;;  %2707 = vmatmul.mubr.msk.f32.vlgmr.msra.gmra.mxu0 %vm303_vm3, %v125_v6  ;;  %506 = vmatprep.subr.mxu0 %v3297_v7  ;;  %v128_v13 = vld [vmem:[%s4301_s3 + $0x8] sm:$0xff]  ;;  %v53_v21 = vld [vmem:[#allocation2 + $0x10] sm:$0x1f]  ;;  %vm3243_vm6 = vmmov 0   ;;  %vm2357_vm7 = vcmask 23552  }
  0x22   :  { %2701 = vmatprep.subr.msk.mxu1 %vm136_vm0, %v58_v9  ;;  %v3307_v12 = vld [vmem:[#allocation2 + $0x200] sm:$0xff]  ;;  %507 = vmatpush1.msra.mxu0 %v3299_v8  ;;  %v3314_v14 = vld [vmem:[#allocation2 + $0x1e8] sm:$0xff]  ;;  %v3369_v30 = vld [vmem:[#allocation2 + $0x230] sm:$0xff]  ;;  %vm2439_vm8 = vcmask 1045504   ;;  %vm2435_vm9 = vcmask 48128   ;;  %vm2600_vm10 = vcmask 523264  }
  0x23   :  { %219 = vmatprep.mubr.f32.mxu1 %v4305_v0  ;;  %508 = vmatprep.subr.mxu0 %v3303_v10  ;;  %v3321_v15 = vld [vmem:[%s4300_s2 + $0x8] sm:$0xff]  ;;  %v3325_v16 = vld [vmem:[#allocation2 + $0x1e0] sm:$0xff]  ;;  %v3375_v32 = vld [vmem:[#allocation2 + $0x218] sm:$0xff]  ;;  %vm2680_vm11 = vcmask 254976   ;;  %vm2689_vm12 = vcmask 1024  }
  0x24   :  { %2702 = vmatpush1.msk.msra.mxu1 %vm136_vm0, %v57_v11  ;;  %509 = vmatpush1.msra.mxu0 %v3307_v12  ;;  %v3329_v18 = vld [vmem:[#allocation2 + $0x1c8] sm:$0xff]  ;;  %v3334_v19 = vld [vmem:[#allocation2 + $0x1c0] sm:$0xff]  ;;  %v3381_v34 = vld [vmem:[#allocation2 + $0x210] sm:$0xff] }
  0x25   :  { %2700 = vmatmul.mubr.msk.f32.gmra.mxu1 %vm129_vm2, %v128_v13  ;;  %393 = vmatprep.mubr.f32.mxu0 %v4305_v0  ;;  %v3337_v20 = vld [vmem:[#allocation2 + $0x1a8] sm:$0xff]  ;;  %v3342_v22 = vld [vmem:[#allocation2 + $0x1a0] sm:$0xff]  ;;  %v3391_v37 = vld [vmem:[#allocation2 + $0x1f8] sm:$0xff] }
  0x26   :  { %510 = vmatprep.subr.mxu0 %v3314_v14  ;;  %2708 = vmatmul.mubr.msk.f32.gmra.mxu0 %vm303_vm3, %v3321_v15  ;;  %4440 = vst [vmem:[#allocation9_spill] sm:$0xff] %v3337_v20  ;;  %v3347_v24 = vld [vmem:[#allocation2 + $0x188] sm:$0xff]  ;;  %v3352_v25 = vld [vmem:[#allocation2 + $0x180] sm:$0xff]  ;;  %v3399_v39 = vld [vmem:[#allocation2 + $0x1f0] sm:$0xff] }
  0x27   :  { %290 = vmatprep.mubr.f32.mxu1 %v4305_v0  ;;  %511 = vmatpush1.msra.mxu0 %v3325_v16  ;;  %v3355_v26 = vld [vmem:[#allocation2 + $0x168] sm:$0xff]  ;;  %v3360_v27 = vld [vmem:[#allocation2 + $0x160] sm:$0xff]  ;;  %v3405_v41 = vld [vmem:[#allocation2 + $0x1d8] sm:$0xff] }
  0x28   :  { %2709 = vmatprep.subr.msk.mxu1 %vm310_vm1, %v54_v17  ;;  %512 = vmatprep.subr.mxu0 %v3329_v18  ;;  %v3363_v28 = vld [vmem:[#allocation2 + $0x148] sm:$0xff]  ;;  %v3367_v29 = vld [vmem:[#allocation2 + $0x140] sm:$0xff]  ;;  %v3412_v43 = vld [vmem:[#allocation2 + $0x1d0] sm:$0xff] }
  0x29   :  { %2703 = vmatmul.mubr.msk.f32.vlgmr.msra.gmra.mxu1 %vm129_vm2, %v127_v5  ;;  %513 = vmatpush1.msra.mxu0 %v3334_v19  ;;  %v3373_v31 = vld [vmem:[#allocation2 + $0x128] sm:$0xff]  ;;  %v3379_v33 = vld [vmem:[#allocation2 + $0x120] sm:$0xff]  ;;  %v3418_v45 = vld [vmem:[#allocation2 + $0x1b8] sm:$0xff] }
  0x2a   :  { %296 = vmatprep.mubr.f32.mxu1 %v4305_v0  ;;  %514 = vmatprep.subr.mxu0 %v3337_v20  ;;  %v3385_v35 = vld [vmem:[#allocation2 + $0x108] sm:$0xff]  ;;  %v3389_v36 = vld [vmem:[#allocation2 + $0x100] sm:$0xff]  ;;  %v3424_v47 = vld [vmem:[#allocation2 + $0x1b0] sm:$0xff] }
  0x2b   :  { %2710 = vmatpush1.msk.msra.mxu1 %vm310_vm1, %v53_v21  ;;  %515 = vmatpush1.msra.mxu0 %v3342_v22  ;;  %4442 = vst [vmem:[#allocation11_spill] sm:$0xff] %v3389_v36  ;;  %v3395_v38 = vld [vmem:[#allocation2 + $0xe8] sm:$0xff]  ;;  %v3401_v40 = vld [vmem:[#allocation2 + $0xe0] sm:$0xff]  ;;  %v3430_v49 = vld [vmem:[#allocation2 + $0x198] sm:$0xff] }
  0x2c   :  { %577 = vmatprep.subr.mxu1 %v3344_v23  ;;  %516 = vmatprep.subr.mxu0 %v3347_v24  ;;  %4443 = vst [vmem:[#allocation12_spill] sm:$0xff] %v3395_v38  ;;  %4444 = vst [vmem:[#allocation13_spill] sm:$0xff] %v3401_v40  ;;  %v3407_v42 = vld [vmem:[#allocation2 + $0xc8] sm:$0xff]  ;;  %v3414_v44 = vld [vmem:[#allocation2 + $0xc0] sm:$0xff] }
  0x2d   :  { %2704 = vmatmul.mubr.msk.f32.gmra.mxu1 %vm129_vm2, %v128_v13  ;;  %517 = vmatpush1.msra.mxu0 %v3352_v25  ;;  %4445 = vst [vmem:[#allocation14_spill] sm:$0xff] %v3407_v42  ;;  %4446 = vst [vmem:[#allocation15_spill] sm:$0xff] %v3414_v44  ;;  %v3420_v46 = vld [vmem:[#allocation2 + $0xa8] sm:$0xff]  ;;  %v3426_v48 = vld [vmem:[#allocation2 + $0xa0] sm:$0xff] }
  0x2e   :  { %464 = vmatprep.mubr.f32.mxu1 %v4305_v0  ;;  %518 = vmatprep.subr.mxu0 %v3355_v26  ;;  %4447 = vst [vmem:[#allocation16_spill] sm:$0xff] %v3420_v46  ;;  %4448 = vst [vmem:[#allocation17_spill] sm:$0xff] %v3426_v48  ;;  %v3432_v50 = vld [vmem:[#allocation2 + $0x88] sm:$0xff]  ;;  %v3436_v51 = vld [vmem:[#allocation2 + $0x190] sm:$0xff] }
  0x2f   :  { %570 = vmatprep.mubr.f32.mxu0 %v4305_v0  ;;  %519 = vmatpush1.msra.mxu0 %v3360_v27  ;;  %4449 = vst [vmem:[#allocation18_spill] sm:$0xff] %v3432_v50  ;;  %v3438_v52 = vld [vmem:[#allocation2 + $0x80] sm:$0xff]  ;;  %v3442_v53 = vld [vmem:[#allocation2 + $0x178] sm:$0xff]  ;;  %v3444_v54 = vld [vmem:[#allocation2 + $0x68] sm:$0xff] }
  0x30   :  { %520 = vmatprep.subr.mxu0 %v3363_v28  ;;  %4450 = vst [vmem:[#allocation19_spill] sm:$0xff] %v3438_v52  ;;  %4451 = vst [vmem:[#allocation20_spill] sm:$0xff] %v3444_v54  ;;  %v3448_v55 = vld [vmem:[#allocation2 + $0x170] sm:$0xff]  ;;  %v3450_v56 = vld [vmem:[#allocation2 + $0x60] sm:$0xff] }
  0x31   :  { %2711 = vmatmul.mubr.msk.f32.vlgmr.msra.gmra.mxu1 %vm303_vm3, %v125_v6  ;;  %521 = vmatpush1.msra.mxu0 %v3367_v29  ;;  %4452 = vst [vmem:[#allocation21_spill] sm:$0xff] %v3450_v56  ;;  %v3454_v57 = vld [vmem:[#allocation2 + $0x158] sm:$0xff]  ;;  %v3456_v58 = vld [vmem:[#allocation2 + $0x48] sm:$0xff]  ;;  %v3460_v59 = vld [vmem:[#allocation2 + $0x150] sm:$0xff] }
  0x32   :  { %578 = vmatpush1.msra.mxu1 %v3369_v30  ;;  %522 = vmatprep.subr.mxu0 %v3373_v31  ;;  %4453 = vst [vmem:[#allocation22_spill] sm:$0xff] %v3456_v58  ;;  %v3462_v60 = vld [vmem:[#allocation2 + $0x40] sm:$0xff]  ;;  %v3466_v61 = vld [vmem:[#allocation2 + $0x138] sm:$0xff]  ;;  %v3470_v62 = vld [vmem:[#allocation2 + $0x130] sm:$0xff] }
  0x33   :  { %579 = vmatprep.subr.mxu1 %v3375_v32  ;;  %523 = vmatpush1.msra.mxu0 %v3379_v33  ;;  %4454 = vst [vmem:[#allocation23_spill] sm:$0xff] %v3462_v60  ;;  %v3474_v63 = vld [vmem:[#allocation2 + $0x118] sm:$0xff]  ;;  %v3478_v1 = vld [vmem:[#allocation2 + $0x110] sm:$0xff] }
  0x34   :  { %580 = vmatpush1.msra.mxu1 %v3381_v34  ;;  %524 = vmatprep.subr.mxu0 %v3385_v35  ;;  %4455 = vst [vmem:[#allocation24_spill] sm:$0xff] %v3478_v1  ;;  %v3481_v2 = vld [vmem:[#allocation2 + $0xf8] sm:$0xff]  ;;  %v3485_v3 = vld [vmem:[#allocation2 + $0xf0] sm:$0xff] }
  0x35   :  { %470 = vmatprep.mubr.f32.mxu1 %v4305_v0  ;;  %525 = vmatpush1.msra.mxu0 %v3389_v36  ;;  %4456 = vst [vmem:[#allocation25_spill] sm:$0xff] %v3481_v2  ;;  %4457 = vst [vmem:[#allocation26_spill] sm:$0xff] %v3485_v3  ;;  %v3489_v4 = vld [vmem:[#allocation2 + $0xd8] sm:$0xff]  ;;  %v3493_v5 = vld [vmem:[#allocation2 + $0xd0] sm:$0xff] }
  0x36   :  { %581 = vmatprep.subr.mxu1 %v3391_v37  ;;  %2712 = vmatmul.mubr.msk.f32.gmra.mxu1 %vm303_vm3, %v3321_v15  ;;  %4458 = vst [vmem:[#allocation27_spill] sm:$0xff] %v3489_v4  ;;  %4459 = vst [vmem:[#allocation28_spill] sm:$0xff] %v3493_v5  ;;  %v3497_v6 = vld [vmem:[#allocation2 + $0xb8] sm:$0xff]  ;;  %v3501_v9 = vld [vmem:[#allocation2 + $0xb0] sm:$0xff] }
  0x37   :  { %526 = vmatprep.subr.mxu0 %v3395_v38  ;;  %582 = vmatpush1.msra.mxu1 %v3399_v39  ;;  %4460 = vst [vmem:[#allocation29_spill] sm:$0xff] %v3497_v6  ;;  %4461 = vst [vmem:[#allocation30_spill] sm:$0xff] %v3501_v9  ;;  %v3505_v11 = vld [vmem:[#allocation2 + $0x98] sm:$0xff]  ;;  %v3509_v13 = vld [vmem:[#allocation2 + $0x90] sm:$0xff] }
  0x38   :  { %527 = vmatpush1.msra.mxu0 %v3401_v40  ;;  %583 = vmatprep.subr.mxu1 %v3405_v41  ;;  %4462 = vst [vmem:[#allocation31_spill] sm:$0xff] %v3505_v11  ;;  %4463 = vst [vmem:[#allocation32_spill] sm:$0xff] %v3509_v13  ;;  %v3513_v15 = vld [vmem:[#allocation2 + $0x78] sm:$0xff]  ;;  %v3517_v17 = vld [vmem:[#allocation2 + $0x70] sm:$0xff] }
  0x39   :  { %528 = vmatprep.subr.mxu0 %v3407_v42  ;;  %584 = vmatpush1.msra.mxu1 %v3412_v43  ;;  %4464 = vst [vmem:[#allocation33_spill] sm:$0xff] %v3513_v15  ;;  %4465 = vst [vmem:[#allocation34_spill] sm:$0xff] %v3517_v17  ;;  %v3521_v21 = vld [vmem:[#allocation2 + $0x58] sm:$0xff] }
  0x3a   :  { %529 = vmatpush1.msra.mxu0 %v3414_v44  ;;  %585 = vmatprep.subr.mxu1 %v3418_v45  ;;  %4466 = vst [vmem:[#allocation35_spill] sm:$0xff] %v3521_v21 }
  0x3b   :  { %530 = vmatprep.subr.mxu0 %v3420_v46  ;;  %586 = vmatpush1.msra.mxu1 %v3424_v47 }
  0x3c   :  { %531 = vmatpush1.msra.mxu0 %v3426_v48  ;;  %587 = vmatprep.subr.mxu1 %v3430_v49 }
  0x3d   :  { %532 = vmatprep.subr.mxu0 %v3432_v50  ;;  %588 = vmatpush1.msra.mxu1 %v3436_v51 }
  0x3e   :  { %533 = vmatpush1.msra.mxu0 %v3438_v52  ;;  %589 = vmatprep.subr.mxu1 %v3442_v53 }
  0x3f   :  { %534 = vmatprep.subr.mxu0 %v3444_v54  ;;  %590 = vmatpush1.msra.mxu1 %v3448_v55 }
  0x40   :  { %535 = vmatpush1.msra.mxu0 %v3450_v56  ;;  %591 = vmatprep.subr.mxu1 %v3454_v57 }
  0x41   :  { %536 = vmatprep.subr.mxu0 %v3456_v58  ;;  %592 = vmatpush1.msra.mxu1 %v3460_v59 }
  0x42   :  { %537 = vmatpush1.msra.mxu0 %v3462_v60  ;;  %593 = vmatprep.subr.mxu1 %v3466_v61 }
  0x43   :  { %571 = vmatmul.mubr.f32.vlgmr.msra.gmra.mxu0 %v4305_v0  ;;  %594 = vmatpush1.msra.mxu1 %v3470_v62 }
  0x44   :  { %641 = vmatprep.mubr.f32.mxu1 %v4305_v0  ;;  %595 = vmatprep.subr.mxu1 %v3474_v63  ;;  %v3525_v0 = vld [vmem:[#allocation2 + $0x50] sm:$0xff] }
  0x45   :  { %726 = vmatprep.subr.mxu0 %v3297_v7  ;;  %596 = vmatpush1.msra.mxu1 %v3478_v1  ;;  %4467 = vst [vmem:[#allocation36_spill] sm:$0xff] %v3525_v0 }
  0x46   :  { %727 = vmatpush1.msra.mxu0 %v3299_v8  ;;  %597 = vmatprep.subr.mxu1 %v3481_v2 }
  0x47   :  { %728 = vmatprep.subr.mxu0 %v3303_v10  ;;  %598 = vmatpush1.msra.mxu1 %v3485_v3 }
  0x48   :  { %729 = vmatpush1.msra.mxu0 %v3307_v12  ;;  %599 = vmatprep.subr.mxu1 %v3489_v4 }
  0x49   :  { %730 = vmatprep.subr.mxu0 %v3314_v14  ;;  %600 = vmatpush1.msra.mxu1 %v3493_v5 }
  0x4a   :  { %731 = vmatpush1.msra.mxu0 %v3325_v16  ;;  %601 = vmatprep.subr.mxu1 %v3497_v6 }
  0x4b   :  { %732 = vmatprep.subr.mxu0 %v3329_v18  ;;  %602 = vmatpush1.msra.mxu1 %v3501_v9 }
  0x4c   :  { %733 = vmatpush1.msra.mxu0 %v3334_v19  ;;  %603 = vmatprep.subr.mxu1 %v3505_v11 }
  0x4d   :  { %734 = vmatprep.subr.mxu0 %v3337_v20  ;;  %604 = vmatpush1.msra.mxu1 %v3509_v13  ;;  %v4468_v20 = vmov 0.0  }
  0x4e   :  { %735 = vmatpush1.msra.mxu0 %v3342_v22  ;;  %605 = vmatprep.subr.mxu1 %v3513_v15 }
  0x4f   :  { %736 = vmatprep.subr.mxu0 %v3347_v24  ;;  %606 = vmatpush1.msra.mxu1 %v3517_v17 }
  0x50   :  { %737 = vmatpush1.msra.mxu0 %v3352_v25  ;;  %607 = vmatprep.subr.mxu1 %v3521_v21 }
  0x51   :  { %738 = vmatprep.subr.mxu0 %v3355_v26  ;;  %608 = vmatpush1.msra.mxu1 %v3525_v0 }
  0x52   :  { %739 = vmatpush1.msra.mxu0 %v3360_v27  ;;  %642 = vmatmul.mubr.f32.vlgmr.msra.gmra.mxu1 %v4468_v20 }
  0x53   :  { %797 = vmatprep.subr.mxu1 %v3344_v23  ;;  %740 = vmatprep.subr.mxu0 %v3363_v28 }
  0x54   :  { %798 = vmatpush1.msra.mxu1 %v3369_v30  ;;  %741 = vmatpush1.msra.mxu0 %v3367_v29 }
  0x55   :  { %799 = vmatprep.subr.mxu1 %v3375_v32  ;;  %742 = vmatprep.subr.mxu0 %v3373_v31 }
  0x56   :  { %800 = vmatpush1.msra.mxu1 %v3381_v34  ;;  %743 = vmatpush1.msra.mxu0 %v3379_v33 }
  0x57   :  { %801 = vmatprep.subr.mxu1 %v3391_v37  ;;  %744 = vmatprep.subr.mxu0 %v3385_v35 }
  0x58   :  { %802 = vmatpush1.msra.mxu1 %v3399_v39  ;;  %745 = vmatpush1.msra.mxu0 %v3389_v36 }
  0x59   :  { %803 = vmatprep.subr.mxu1 %v3405_v41  ;;  %746 = vmatprep.subr.mxu0 %v3395_v38 }
  0x5a   :  { %804 = vmatpush1.msra.mxu1 %v3412_v43  ;;  %747 = vmatpush1.msra.mxu0 %v3401_v40 }
  0x5b   :  { %805 = vmatprep.subr.mxu1 %v3418_v45  ;;  %748 = vmatprep.subr.mxu0 %v3407_v42 }
  0x5c   :  { %806 = vmatpush1.msra.mxu1 %v3424_v47  ;;  %749 = vmatpush1.msra.mxu0 %v3414_v44 }
  0x5d   :  { %807 = vmatprep.subr.mxu1 %v3430_v49  ;;  %750 = vmatprep.subr.mxu0 %v3420_v46 }
  0x5e   :  { %808 = vmatpush1.msra.mxu1 %v3436_v51  ;;  %751 = vmatpush1.msra.mxu0 %v3426_v48  ;;  %v124_v48 = vld [vmem:[#allocation2 + $0x240] ss:$8 sm:$0xf] }
  0x5f   :  { %809 = vmatprep.subr.mxu1 %v3442_v53  ;;  %752 = vmatprep.subr.mxu0 %v3432_v50 }
  0x60   :  { %810 = vmatpush1.msra.mxu1 %v3448_v55  ;;  %753 = vmatpush1.msra.mxu0 %v3438_v52 }
  0x61   :  { %811 = vmatprep.subr.mxu1 %v3454_v57  ;;  %754 = vmatprep.subr.mxu0 %v3444_v54  ;;  %v478_v54 = vlaneseq }
  0x62   :  { %812 = vmatpush1.msra.mxu1 %v3460_v59  ;;  %755 = vmatpush1.msra.mxu0 %v3450_v56 }
  0x63   :  { %813 = vmatprep.subr.mxu1 %v3466_v61  ;;  %756 = vmatprep.subr.mxu0 %v3456_v58 }
  0x64   :  { %814 = vmatpush1.msra.mxu1 %v3470_v62  ;;  %757 = vmatpush1.msra.mxu0 %v3462_v60 }
  0x65   :  { %815 = vmatprep.subr.mxu1 %v3474_v63  ;;  %790 = vmatprep.mubr.f32.mxu0 %v4468_v20 }
  0x66   :  { %816 = vmatpush1.msra.mxu1 %v3478_v1  ;;  %861 = vmatprep.mubr.f32.mxu1 %v4468_v20 }
  0x67   :  { %817 = vmatprep.subr.mxu1 %v3481_v2  ;;  %951 = vmatprep.subr.mxu0 %v3297_v7 }
  0x68   :  { %818 = vmatpush1.msra.mxu1 %v3485_v3 }
  0x69   :  { %819 = vmatprep.subr.mxu1 %v3489_v4 }
  0x6a   :  { %820 = vmatpush1.msra.mxu1 %v3493_v5 }
  0x6b   :  { %821 = vmatprep.subr.mxu1 %v3497_v6 }
  0x6c   :  { %822 = vmatpush1.msra.mxu1 %v3501_v9 }
  0x6d   :  { %823 = vmatprep.subr.mxu1 %v3505_v11  ;;  %v479_v11 = vshrl.u32 %v478_v54, 7 }
  0x6e   :  { %824 = vmatpush1.msra.mxu1 %v3509_v13 }
  0x6f   :  { %825 = vmatprep.subr.mxu1 %v3513_v15  ;;  %v480_v9 = vsub.s32 0, %v479_v11 }
  0x70   :  { %826 = vmatpush1.msra.mxu1 %v3517_v17  ;;  %v484_v17 = vsub.s32 1, %v479_v11 }
  0x71   :  { %827 = vmatprep.subr.mxu1 %v3521_v21  ;;  %v481_v46 = vrot.slane %v124_v48, %v480_v9 }
  0x72   :  { %828 = vmatpush1.msra.mxu1 %v3525_v0 }
  0x73   :  { %1022 = vmatprep.subr.mxu1 %v3344_v23  ;;  %v485_v23 = vrot.slane %v124_v48, %v484_v17  ;;  %v492_v17 = vsub.s32 3, %v479_v11 }
  0xe0   :  { %v215_v7 = vpop.f32.mrf.mxu1 }
  0xe1   :  { %v389_v56 = vpop.f32.mrf.mxu0 }
  0xe2   :  { %v217_v20 = vpop.f32.mrf.mxu1  ;;  %v390_v21 = vadd.f32 %v389_v56, %v215_v7 }
  0xe3   :  { %v391_v50 = vpop.f32.mrf.mxu0 }
  0xe4   :  { %v392_v5 = vadd.f32 %v391_v50, %v217_v20  ;;  %v3589_v3 = vadd.f32 %v481_v46, %v390_v21 }
  0xe5   :  { %v221_v60 = vpop.f32.mrf.mxu1 }
  0xe6   :  { %v395_v15 = vpop.f32.mrf.mxu0  ;;  %4469 = vst [vmem:[#allocation37_spill] sm:$0xff] %v3589_v3  ;;  %v3591_v2 = vadd.f32 %v485_v23, %v392_v5 }
  0xe7   :  { %v223_v58 = vpop.f32.mrf.mxu1  ;;  %v396_v44 = vadd.f32 %v395_v15, %v221_v60 }
  0xe8   :  { %v397_v0 = vpop.f32.mrf.mxu0  ;;  %4470 = vst [vmem:[#allocation38_spill] sm:$0xff] %v3591_v2 }
  0xe9   :  { %v292_v52 = vpop.f32.mrf.mxu1  ;;  %v398_v4 = vadd.f32 %v397_v0, %v223_v58  ;;  %v3593_v54 = vadd.f32 %v481_v46, %v396_v44  ;;  %v488_v46 = vsub.s32 2, %v479_v11 }
  0xeb   :  { %v294_v13 = vpop.f32.mrf.mxu1  ;;  %4471 = vst [vmem:[#allocation39_spill] sm:$0xff] %v3593_v54  ;;  %v3596_v36 = vadd.f32 %v485_v23, %v398_v4  ;;  %v489_v4 = vrot.slane %v124_v48, %v488_v46 }
  0xed   :  { %v298_v6 = vpop.f32.mrf.mxu1 }
  0xef   :  { %v300_v42 = vpop.f32.mrf.mxu1 }
  0xf1   :  { %v466_v7 = vpop.f32.mrf.mxu1 }
  0xf3   :  { %v468_v44 = vpop.f32.mrf.mxu1 }
  0xf6   :  { %v472_v23 = vpop.f32.mrf.mxu1 }
 0x103   :  { %v572_v40 = vpop.f32.mrf.mxu0 }
 0x104   :  { %v652_v38 = vrot.slane %v572_v40, 1  ;;  %v664_v1 = vadd.f32 %v572_v40, %v3589_v3  ;;  %v467_v40 = vadd.f32 %v466_v7, %v292_v52 }
 0x105   :  { %v574_v56 = vpop.f32.mrf.mxu0 }
 0x106   :  { %v668_v20 = vadd.f32 %v652_v38, %v3593_v54  ;;  %v2713_v50 = vmul.f32 -1.442695, %v664_v1  ;;  %v653_v60 = vrot.slane %v574_v56, 1  ;;  %v665_v0 = vadd.f32 %v574_v56, %v3591_v2  ;;  %v474_v1 = vpop.f32.mrf.mxu1 }
 0x107   :  { %v473_v38 = vadd.f32 %v472_v23, %v298_v6  ;;  %v3601_v21 = vadd.f32 %v489_v4, %v467_v40  ;;  %v493_v56 = vrot.slane %v124_v48, %v492_v17 }
 0x108   :  { %2872 = vpow2.f32 %v2713_v50  ;;  %v2716_v58 = vmul.f32 -1.442695, %v668_v20  ;;  %v669_v5 = vadd.f32 %v653_v60, %v3596_v36  ;;  %v2714_v9 = vmul.f32 -1.442695, %v665_v0 }
 0x109   :  { %v469_v20 = vadd.f32 %v468_v44, %v294_v13  ;;  %v3603_v2 = vadd.f32 %v489_v4, %v473_v38 }
 0x10a   :  { %2874 = vpow2.f32 %v2716_v58  ;;  %v2717_v15 = vmul.f32 -1.442695, %v669_v5  ;;  %v475_v5 = vadd.f32 %v474_v1, %v300_v42 }
 0x10b   :  { %2876 = vpow2.f32 %v2714_v9  ;;  %4472 = vst [vmem:[#allocation40_spill] sm:$0xff] %v3603_v2  ;;  %v3607_v23 = vadd.f32 %v493_v56, %v469_v20 }
 0x10c   :  { %2878 = vpow2.f32 %v2717_v15  ;;  %v3609_v44 = vadd.f32 %v493_v56, %v475_v5 }
 0x10d   :  { %4473 = vst [vmem:[#allocation41_spill] sm:$0xff] %v3607_v23 }
 0x10e   :  { %4474 = vst [vmem:[#allocation42_spill] sm:$0xff] %v3609_v44 }
 0x112   :  { %v643_v50 = vpop.f32.mrf.mxu1 }
 0x113   :  { %v654_v60 = vrot.slane %v643_v50, 1  ;;  %v666_v0 = vadd.f32 %v643_v50, %v3601_v21 }
 0x114   :  { %v645_v9 = vpop.f32.mrf.mxu1 }
 0x115   :  { %v2873_v58 = vpop.eup %2872  ;;  %v670_v52 = vadd.f32 %v654_v60, %v3603_v2  ;;  %v2715_v7 = vmul.f32 -1.442695, %v666_v0  ;;  %v655_v6 = vrot.slane %v645_v9, 1  ;;  %v667_v17 = vadd.f32 %v645_v9, %v3607_v23 }
 0x116   :  { %v690_v15 = vadd.f32 1.0, %v2873_v58 }
 0x117   :  { %v2875_v11 = vpop.eup %2874  ;;  %v2718_v4 = vmul.f32 -1.442695, %v670_v52  ;;  %v671_v38 = vadd.f32 %v655_v6, %v3609_v44 }
 0x118   :  { %v2877_v46 = vpop.eup %2876  ;;  %v693_v48 = vadd.f32 1.0, %v2875_v11  ;;  %2880 = vrcp.f32 %v690_v15 }
 0x119   :  { %v2879_v13 = vpop.eup %2878  ;;  %v691_v40 = vadd.f32 1.0, %v2877_v46  ;;  %2882 = vpow2.f32 %v2715_v7 }
 0x11a   :  { %2884 = vrcp.f32 %v693_v48  ;;  %v694_v42 = vadd.f32 1.0, %v2879_v13 }
 0x11b   :  { %2886 = vrcp.f32 %v691_v40 }
 0x11c   :  { %2888 = vrcp.f32 %v694_v42 }
 0x11d   :  { %2890 = vpow2.f32 %v2718_v4 }
 0x11e   :  { %2892 = vtanh.f32 %v667_v17 }
 0x11f   :  { %2894 = vtanh.f32 %v671_v38 }
 0x125   :  { %v2881_v1 = vpop.eup %2880 }
 0x126   :  { %v2883_v50 = vpop.eup %2882 }
 0x127   :  { %v2885_v20 = vpop.eup %2884  ;;  %v692_v6 = vadd.f32 1.0, %v2883_v50  ;;  %v4475_v50 = vld [vmem:[#allocation9_spill] sm:$0xff] }
 0x128   :  { %v2887_v60 = vpop.eup %2886 }
 0x129   :  { %v2889_v56 = vpop.eup %2888  ;;  %v710_v58 = vmul.f32 0.0, %v2887_v60  ;;  %v4476_v60 = vld [vmem:[#allocation11_spill] sm:$0xff] }
 0x12a   :  { %v2891_v0 = vpop.eup %2890  ;;  %v711_v15 = vmul.f32 0.0, %v2889_v56  ;;  %v4477_v56 = vld [vmem:[#allocation24_spill] sm:$0xff] }
 0x12b   :  { %v2893_v5 = vpop.eup %2892  ;;  %v695_v52 = vadd.f32 1.0, %v2891_v0  ;;  %v4478_v0 = vld [vmem:[#allocation12_spill] sm:$0xff] }
 0x12c   :  { %v2895_v7 = vpop.eup %2894  ;;  %v712_v11 = vmul.f32 %v2893_v5, %v2881_v1  ;;  %v4480_v5 = vld [vmem:[#allocation13_spill] sm:$0xff] }
 0x12d   :  { %v713_v9 = vmul.f32 %v2895_v7, %v2885_v20  ;;  %2896 = vrcp.f32 %v695_v52  ;;  %v4482_v52 = vld [vmem:[#allocation14_spill] sm:$0xff]  ;;  %v4483_v7 = vld [vmem:[#allocation27_spill] sm:$0xff] }
 0x12e   :  { %v3613_v46 = vadd.f32 %v712_v11, %v710_v58  ;;  %v4479_v58 = vld [vmem:[#allocation25_spill] sm:$0xff]  ;;  %v4484_v11 = vld [vmem:[#allocation15_spill] sm:$0xff] }
 0x12f   :  { %v3615_v48 = vadd.f32 %v713_v9, %v711_v15  ;;  %v4481_v15 = vld [vmem:[#allocation26_spill] sm:$0xff]  ;;  %v4485_v9 = vld [vmem:[#allocation28_spill] sm:$0xff] }
 0x130   :  { %2898 = vtanh.f32 %v3613_v46 }
 0x131   :  { %2900 = vtanh.f32 %v3615_v48 }
 0x132   :  { %2902 = vrcp.f32 %v692_v6  ;;  %v4486_v6 = vld [vmem:[#allocation16_spill] sm:$0xff] }
 0x13a   :  { %v2897_v13 = vpop.eup %2896 }
 0x13d   :  { %v2899_v40 = vpop.eup %2898 }
 0x13e   :  { %v2901_v4 = vpop.eup %2900 }
 0x13f   :  { %v719_v42 = vmul.f32 %v2901_v4, %v2897_v13  ;;  %v2903_v17 = vpop.eup %2902  ;;  %v4487_v13 = vld [vmem:[#allocation29_spill] sm:$0xff]  ;;  %v4489_v4 = vld [vmem:[#allocation30_spill] sm:$0xff] }
 0x140   :  { %v718_v38 = vmul.f32 %v2903_v17, %v2899_v40  ;;  %v4488_v40 = vld [vmem:[#allocation17_spill] sm:$0xff]  ;;  %v4491_v17 = vld [vmem:[#allocation31_spill] sm:$0xff] }
 0x141   :  { %v722_v1 = vrot.slane %v719_v42, 7  ;;  %v4490_v42 = vld [vmem:[#allocation18_spill] sm:$0xff] }
 0x143   :  { %v724_v20 = vsel %vm723_vm4, %v722_v1, %v718_v38  ;;  %v4492_v38 = vld [vmem:[#allocation19_spill] sm:$0xff]  ;;  %v4493_v1 = vld [vmem:[#allocation32_spill] sm:$0xff] }
 0x144   :  { %791 = vmatmul.mubr.f32.vlgmr.msra.gmra.mxu0 %v724_v20  ;;  %862 = vmatmul.mubr.f32.vlgmr.msra.gmra.mxu1 %v724_v20  ;;  %v4494_v20 = vld [vmem:[#allocation20_spill] sm:$0xff] }
 0x145   :  { %952 = vmatpush1.msra.mxu0 %v3299_v8  ;;  %1023 = vmatpush1.msra.mxu1 %v3369_v30 }
 0x146   :  { %953 = vmatprep.subr.mxu0 %v3303_v10  ;;  %1024 = vmatprep.subr.mxu1 %v3375_v32 }
 0x147   :  { %954 = vmatpush1.msra.mxu0 %v3307_v12  ;;  %1025 = vmatpush1.msra.mxu1 %v3381_v34 }
 0x148   :  { %955 = vmatprep.subr.mxu0 %v3314_v14  ;;  %1026 = vmatprep.subr.mxu1 %v3391_v37 }
 0x149   :  { %956 = vmatpush1.msra.mxu0 %v3325_v16  ;;  %1027 = vmatpush1.msra.mxu1 %v3399_v39 }
 0x14a   :  { %957 = vmatprep.subr.mxu0 %v3329_v18  ;;  %1028 = vmatprep.subr.mxu1 %v3405_v41 }
 0x14b   :  { %958 = vmatpush1.msra.mxu0 %v3334_v19  ;;  %1029 = vmatpush1.msra.mxu1 %v3412_v43 }
 0x14c   :  { %959 = vmatprep.subr.mxu0 %v4475_v50  ;;  %1030 = vmatprep.subr.mxu1 %v3418_v45 }
 0x14d   :  { %960 = vmatpush1.msra.mxu0 %v3342_v22  ;;  %1031 = vmatpush1.msra.mxu1 %v3424_v47 }
 0x14e   :  { %961 = vmatprep.subr.mxu0 %v3347_v24  ;;  %1032 = vmatprep.subr.mxu1 %v3430_v49 }
 0x14f   :  { %962 = vmatpush1.msra.mxu0 %v3352_v25  ;;  %1033 = vmatpush1.msra.mxu1 %v3436_v51 }
 0x150   :  { %963 = vmatprep.subr.mxu0 %v3355_v26  ;;  %1034 = vmatprep.subr.mxu1 %v3442_v53 }
 0x151   :  { %964 = vmatpush1.msra.mxu0 %v3360_v27  ;;  %1035 = vmatpush1.msra.mxu1 %v3448_v55 }
 0x152   :  { %965 = vmatprep.subr.mxu0 %v3363_v28  ;;  %1036 = vmatprep.subr.mxu1 %v3454_v57 }
 0x153   :  { %966 = vmatpush1.msra.mxu0 %v3367_v29  ;;  %1037 = vmatpush1.msra.mxu1 %v3460_v59 }
 0x154   :  { %967 = vmatprep.subr.mxu0 %v3373_v31  ;;  %1038 = vmatprep.subr.mxu1 %v3466_v61 }
 0x155   :  { %968 = vmatpush1.msra.mxu0 %v3379_v33  ;;  %1039 = vmatpush1.msra.mxu1 %v3470_v62 }
 0x156   :  { %969 = vmatprep.subr.mxu0 %v3385_v35  ;;  %1040 = vmatprep.subr.mxu1 %v3474_v63 }
 0x157   :  { %970 = vmatpush1.msra.mxu0 %v4476_v60  ;;  %1041 = vmatpush1.msra.mxu1 %v4477_v56 }
 0x158   :  { %971 = vmatprep.subr.mxu0 %v4478_v0  ;;  %1042 = vmatprep.subr.mxu1 %v4479_v58 }
 0x159   :  { %972 = vmatpush1.msra.mxu0 %v4480_v5  ;;  %1043 = vmatpush1.msra.mxu1 %v4481_v15  ;;  %v4505_v15 = vld [vmem:[#allocation38_spill] sm:$0xff] }
 0x15a   :  { %973 = vmatprep.subr.mxu0 %v4482_v52  ;;  %1044 = vmatprep.subr.mxu1 %v4483_v7 }
 0x15b   :  { %974 = vmatpush1.msra.mxu0 %v4484_v11  ;;  %1045 = vmatpush1.msra.mxu1 %v4485_v9  ;;  %v4495_v11 = vld [vmem:[#allocation33_spill] sm:$0xff] }
 0x15c   :  { %975 = vmatprep.subr.mxu0 %v4486_v6  ;;  %1046 = vmatprep.subr.mxu1 %v4487_v13  ;;  %v4496_v9 = vld [vmem:[#allocation21_spill] sm:$0xff]  ;;  %v4497_v6 = vld [vmem:[#allocation34_spill] sm:$0xff] }
 0x15d   :  { %976 = vmatpush1.msra.mxu0 %v4488_v40  ;;  %1047 = vmatpush1.msra.mxu1 %v4489_v4  ;;  %v4498_v13 = vld [vmem:[#allocation22_spill] sm:$0xff]  ;;  %v4499_v40 = vld [vmem:[#allocation35_spill] sm:$0xff] }
 0x15e   :  { %977 = vmatprep.subr.mxu0 %v4490_v42  ;;  %1048 = vmatprep.subr.mxu1 %v4491_v17  ;;  %v4500_v4 = vld [vmem:[#allocation23_spill] sm:$0xff]  ;;  %v4501_v42 = vmov 0.0   ;;  %v4502_v17 = vld [vmem:[#allocation36_spill] sm:$0xff] }
 0x15f   :  { %978 = vmatpush1.msra.mxu0 %v4492_v38  ;;  %1049 = vmatpush1.msra.mxu1 %v4493_v1  ;;  %v4503_v1 = vld [vmem:[#allocation8_spill] sm:$0xff] }
 0x160   :  { %979 = vmatprep.subr.mxu0 %v4494_v20  ;;  %1050 = vmatprep.subr.mxu1 %v4495_v11  ;;  %v4504_v20 = vld [vmem:[#allocation10_spill] sm:$0xff] }
 0x161   :  { %980 = vmatpush1.msra.mxu0 %v4496_v9  ;;  %1051 = vmatpush1.msra.mxu1 %v4497_v6 }
 0x162   :  { %981 = vmatprep.subr.mxu0 %v4498_v13  ;;  %1052 = vmatprep.subr.mxu1 %v4499_v40 }
 0x163   :  { %982 = vmatpush1.msra.mxu0 %v4500_v4  ;;  %1015 = vmatprep.mubr.f32.mxu0 %v4501_v42 }
 0x164   :  { %1053 = vmatpush1.msra.mxu1 %v4502_v17  ;;  %1086 = vmatprep.mubr.f32.mxu1 %v4501_v42 }
 0x165   :  { %1181 = vmatprep.subr.mxu0 %v4503_v1  ;;  %1252 = vmatprep.subr.mxu1 %v4504_v20 }
 0x204   :  { %v792_v11 = vpop.f32.mrf.mxu0  ;;  %v863_v17 = vpop.f32.mrf.mxu1 }
 0x205   :  { %v872_v9 = vrot.slane %v792_v11, 7  ;;  %v888_v6 = vadd.f32 %v792_v11, %v3593_v54  ;;  %v874_v1 = vrot.slane %v863_v17, 7  ;;  %v890_v11 = vadd.f32 %v863_v17, %v3603_v2 }
 0x206   :  { %v794_v38 = vpop.f32.mrf.mxu0  ;;  %v865_v58 = vpop.f32.mrf.mxu1 }
 0x207   :  { %v884_v13 = vadd.f32 %v872_v9, %v3589_v3  ;;  %v2722_v40 = vmul.f32 -1.442695, %v888_v6  ;;  %v873_v7 = vrot.slane %v794_v38, 7  ;;  %v889_v4 = vadd.f32 %v794_v38, %v3596_v36 }
 0x208   :  { %v886_v9 = vadd.f32 %v874_v1, %v3601_v21  ;;  %v875_v6 = vrot.slane %v865_v58, 7  ;;  %v2724_v54 = vmul.f32 -1.442695, %v890_v11  ;;  %v891_v38 = vadd.f32 %v865_v58, %v3609_v44 }
 0x209   :  { %v2719_v52 = vmul.f32 -1.442695, %v884_v13  ;;  %2904 = vpow2.f32 %v2722_v40  ;;  %v885_v42 = vadd.f32 %v873_v7, %v4505_v15  ;;  %v2723_v5 = vmul.f32 -1.442695, %v889_v4 }
 0x20a   :  { %v2721_v3 = vmul.f32 -1.442695, %v886_v9  ;;  %v887_v13 = vadd.f32 %v875_v6, %v3607_v23 }
 0x20b   :  { %2906 = vpow2.f32 %v2719_v52  ;;  %v2720_v20 = vmul.f32 -1.442695, %v885_v42 }
 0x20c   :  { %2908 = vpow2.f32 %v2723_v5 }
 0x20d   :  { %2910 = vpow2.f32 %v2720_v20 }
 0x20e   :  { %2912 = vpow2.f32 %v2724_v54  ;;  %v933_v54 = vrot.slane %v3615_v48, 7 }
 0x20f   :  { %2914 = vpow2.f32 %v2721_v3 }
 0x210   :  { %2916 = vtanh.f32 %v887_v13  ;;  %v932_v13 = vrot.slane %v3613_v46, 7 }
 0x211   :  { %2918 = vtanh.f32 %v891_v38 }
 0x216   :  { %v2905_v40 = vpop.eup %2904 }
 0x217   :  { %v913_v7 = vadd.f32 1.0, %v2905_v40 }
 0x218   :  { %v2907_v52 = vpop.eup %2906 }
 0x219   :  { %v910_v4 = vadd.f32 1.0, %v2907_v52  ;;  %v2909_v5 = vpop.eup %2908  ;;  %2920 = vrcp.f32 %v913_v7 }
 0x21a   :  { %v2911_v42 = vpop.eup %2910  ;;  %v914_v17 = vadd.f32 1.0, %v2909_v5 }
 0x21b   :  { %2922 = vrcp.f32 %v910_v4  ;;  %v911_v20 = vadd.f32 1.0, %v2911_v42  ;;  %v2913_v1 = vpop.eup %2912 }
 0x21c   :  { %2924 = vrcp.f32 %v914_v17  ;;  %v2915_v11 = vpop.eup %2914  ;;  %v915_v17 = vadd.f32 1.0, %v2913_v1 }
 0x21d   :  { %2926 = vrcp.f32 %v911_v20  ;;  %v2917_v9 = vpop.eup %2916  ;;  %v912_v52 = vadd.f32 1.0, %v2915_v11 }
 0x21e   :  { %v2919_v6 = vpop.eup %2918 }
 0x21f   :  { %2928 = vrcp.f32 %v912_v52  ;;  %v4534_v52 = vld [vmem:[#allocation40_spill] sm:$0xff] }
 0x226   :  { %v2921_v58 = vpop.eup %2920 }
 0x227   :  { %v939_v7 = vmul.f32 %v2921_v58, %v2919_v6 }
 0x228   :  { %v2923_v40 = vpop.eup %2922 }
 0x229   :  { %v2925_v3 = vpop.eup %2924  ;;  %v938_v4 = vmul.f32 %v2923_v40, %v2917_v9 }
 0x22a   :  { %v2927_v38 = vpop.eup %2926  ;;  %v937_v44 = vmul.f32 %v2925_v3, %v933_v54 }
 0x22b   :  { %v936_v5 = vmul.f32 %v2927_v38, %v932_v13 }
 0x22c   :  { %v3696_v42 = vadd.f32 %v939_v7, %v937_v44  ;;  %v2929_v48 = vpop.eup %2928 }
 0x22d   :  { %v3698_v20 = vadd.f32 %v938_v4, %v936_v5 }
 0x22e   :  { %2930 = vtanh.f32 %v3696_v42 }
 0x22f   :  { %2932 = vtanh.f32 %v3698_v20 }
 0x230   :  { %2934 = vrcp.f32 %v915_v17 }
 0x23b   :  { %v2931_v23 = vpop.eup %2930 }
 0x23c   :  { %v2933_v46 = vpop.eup %2932 }
 0x23d   :  { %v944_v11 = vmul.f32 %v2933_v46, %v2929_v48  ;;  %v2935_v2 = vpop.eup %2934  ;;  %v4535_v48 = vld [vmem:[#allocation41_spill] sm:$0xff] }
 0x23e   :  { %v945_v54 = vmul.f32 %v2935_v2, %v2931_v23 }
 0x23f   :  { %v948_v6 = vrot.slane %v944_v11, 1 }
 0x241   :  { %v949_v9 = vsel %vm723_vm4, %v945_v54, %v948_v6  ;;  %v4536_v54 = vld [vmem:[#allocation42_spill] sm:$0xff] }
 0x242   :  { %1016 = vmatmul.mubr.f32.vlgmr.msra.gmra.mxu0 %v949_v9  ;;  %1087 = vmatmul.mubr.f32.vlgmr.msra.gmra.mxu1 %v949_v9 }
 0x243   :  { %1182 = vmatpush1.msra.mxu0 %v3299_v8  ;;  %1253 = vmatpush1.msra.mxu1 %v3369_v30  ;;  %v4506_v8 = vld [vmem:[#allocation25_spill] sm:$0xff]  ;;  %v4520_v30 = vld [vmem:[#allocation32_spill] sm:$0xff] }
 0x244   :  { %1183 = vmatprep.subr.mxu0 %v3303_v10  ;;  %1254 = vmatprep.subr.mxu1 %v3375_v32  ;;  %v4507_v10 = vld [vmem:[#allocation13_spill] sm:$0xff] }
 0x245   :  { %1184 = vmatpush1.msra.mxu0 %v3307_v12  ;;  %1255 = vmatpush1.msra.mxu1 %v3381_v34  ;;  %v4508_v12 = vld [vmem:[#allocation26_spill] sm:$0xff]  ;;  %v4522_v32 = vld [vmem:[#allocation33_spill] sm:$0xff] }
 0x246   :  { %1185 = vmatprep.subr.mxu0 %v3314_v14  ;;  %1256 = vmatprep.subr.mxu1 %v3391_v37  ;;  %v4509_v14 = vld [vmem:[#allocation14_spill] sm:$0xff]  ;;  %v4526_v37 = vld [vmem:[#allocation35_spill] sm:$0xff] }
 0x247   :  { %1186 = vmatpush1.msra.mxu0 %v3325_v16  ;;  %1257 = vmatpush1.msra.mxu1 %v3399_v39  ;;  %v4510_v16 = vld [vmem:[#allocation27_spill] sm:$0xff]  ;;  %v4524_v34 = vld [vmem:[#allocation34_spill] sm:$0xff] }
 0x248   :  { %1187 = vmatprep.subr.mxu0 %v3329_v18  ;;  %1258 = vmatprep.subr.mxu1 %v3405_v41  ;;  %v4511_v18 = vld [vmem:[#allocation15_spill] sm:$0xff]  ;;  %v4528_v41 = vmov 0.0  }
 0x249   :  { %1188 = vmatpush1.msra.mxu0 %v3334_v19  ;;  %1259 = vmatpush1.msra.mxu1 %v3412_v43  ;;  %v4512_v19 = vld [vmem:[#allocation28_spill] sm:$0xff]  ;;  %v4527_v39 = vld [vmem:[#allocation23_spill] sm:$0xff] }
 0x24a   :  { %1189 = vmatprep.subr.mxu0 %v4475_v50  ;;  %1260 = vmatprep.subr.mxu1 %v3418_v45  ;;  %v4529_v43 = vld [vmem:[#allocation36_spill] sm:$0xff]  ;;  %v3767_v45 = vld [vmem:[#allocation2 + $0x228] sm:$0xff] }
 0x24b   :  { %1190 = vmatpush1.msra.mxu0 %v3342_v22  ;;  %1261 = vmatpush1.msra.mxu1 %v3424_v47  ;;  %v4513_v22 = vld [vmem:[#allocation16_spill] sm:$0xff]  ;;  %4530 = vst [vmem:[#allocation9_spill] sm:$0xff] %v3767_v45  ;;  %v4531_v47 = vld [vmem:[#allocation10_spill] sm:$0xff] }
 0x24c   :  { %1191 = vmatprep.subr.mxu0 %v3347_v24  ;;  %1262 = vmatprep.subr.mxu1 %v3430_v49  ;;  %v4514_v24 = vld [vmem:[#allocation29_spill] sm:$0xff] }
 0x24d   :  { %1192 = vmatpush1.msra.mxu0 %v3352_v25  ;;  %1263 = vmatpush1.msra.mxu1 %v3436_v51  ;;  %v4515_v25 = vld [vmem:[#allocation17_spill] sm:$0xff] }
 0x24e   :  { %1193 = vmatprep.subr.mxu0 %v3355_v26  ;;  %1264 = vmatprep.subr.mxu1 %v3442_v53  ;;  %v4516_v26 = vld [vmem:[#allocation30_spill] sm:$0xff] }
 0x24f   :  { %1194 = vmatpush1.msra.mxu0 %v3360_v27  ;;  %1265 = vmatpush1.msra.mxu1 %v3448_v55  ;;  %v4517_v27 = vld [vmem:[#allocation18_spill] sm:$0xff] }
 0x250   :  { %1195 = vmatprep.subr.mxu0 %v3363_v28  ;;  %1266 = vmatprep.subr.mxu1 %v3454_v57  ;;  %v4518_v28 = vld [vmem:[#allocation31_spill] sm:$0xff]  ;;  %v4532_v57 = vld [vmem:[#allocation37_spill] sm:$0xff] }
 0x251   :  { %1196 = vmatpush1.msra.mxu0 %v3367_v29  ;;  %1267 = vmatpush1.msra.mxu1 %v3460_v59  ;;  %v4519_v29 = vld [vmem:[#allocation19_spill] sm:$0xff] }
 0x252   :  { %1197 = vmatprep.subr.mxu0 %v3373_v31  ;;  %1268 = vmatprep.subr.mxu1 %v3466_v61  ;;  %v4521_v31 = vld [vmem:[#allocation20_spill] sm:$0xff]  ;;  %v4533_v61 = vld [vmem:[#allocation39_spill] sm:$0xff] }
 0x253   :  { %1198 = vmatpush1.msra.mxu0 %v3379_v33  ;;  %1269 = vmatpush1.msra.mxu1 %v3470_v62  ;;  %v4523_v33 = vld [vmem:[#allocation21_spill] sm:$0xff] }
 0x254   :  { %1199 = vmatprep.subr.mxu0 %v3385_v35  ;;  %1270 = vmatprep.subr.mxu1 %v3474_v63  ;;  %v4525_v35 = vld [vmem:[#allocation22_spill] sm:$0xff] }
 0x255   :  { %1200 = vmatpush1.msra.mxu0 %v4476_v60  ;;  %1271 = vmatpush1.msra.mxu1 %v4477_v56 }
 0x256   :  { %1201 = vmatprep.subr.mxu0 %v4478_v0  ;;  %1272 = vmatprep.subr.mxu1 %v4506_v8 }
 0x257   :  { %1202 = vmatpush1.msra.mxu0 %v4507_v10  ;;  %1273 = vmatpush1.msra.mxu1 %v4508_v12 }
 0x258   :  { %1203 = vmatprep.subr.mxu0 %v4509_v14  ;;  %1274 = vmatprep.subr.mxu1 %v4510_v16 }
 0x259   :  { %1204 = vmatpush1.msra.mxu0 %v4511_v18  ;;  %1275 = vmatpush1.msra.mxu1 %v4512_v19 }
 0x25a   :  { %1205 = vmatprep.subr.mxu0 %v4513_v22  ;;  %1276 = vmatprep.subr.mxu1 %v4514_v24 }
 0x25b   :  { %1206 = vmatpush1.msra.mxu0 %v4515_v25  ;;  %1277 = vmatpush1.msra.mxu1 %v4516_v26 }
 0x25c   :  { %1207 = vmatprep.subr.mxu0 %v4517_v27  ;;  %1278 = vmatprep.subr.mxu1 %v4518_v28  ;;  %v1161_v28 = vrot.slane %v3698_v20, 7 }
 0x25d   :  { %1208 = vmatpush1.msra.mxu0 %v4519_v29  ;;  %1279 = vmatpush1.msra.mxu1 %v4520_v30 }
 0x25e   :  { %1209 = vmatprep.subr.mxu0 %v4521_v31  ;;  %1280 = vmatprep.subr.mxu1 %v4522_v32  ;;  %v1162_v31 = vrot.slane %v3696_v42, 7 }
 0x25f   :  { %1210 = vmatpush1.msra.mxu0 %v4523_v33  ;;  %1281 = vmatpush1.msra.mxu1 %v4524_v34 }
 0x260   :  { %1211 = vmatprep.subr.mxu0 %v4525_v35  ;;  %1282 = vmatprep.subr.mxu1 %v4526_v37 }
 0x261   :  { %1212 = vmatpush1.msra.mxu0 %v4527_v39  ;;  %1245 = vmatprep.mubr.f32.mxu0 %v4528_v41 }
 0x262   :  { %1283 = vmatpush1.msra.mxu1 %v4529_v43  ;;  %1316 = vmatprep.mubr.f32.mxu1 %v4528_v41 }
 0x263   :  { %1411 = vmatprep.subr.mxu0 %v3767_v45  ;;  %1482 = vmatprep.subr.mxu1 %v4531_v47 }
 0x302   :  { %v1017_v49 = vpop.f32.mrf.mxu0  ;;  %v1088_v50 = vpop.f32.mrf.mxu1 }
 0x303   :  { %v1097_v51 = vrot.slane %v1017_v49, 6  ;;  %v1101_v53 = vrot.slane %v1017_v49, 7  ;;  %v1099_v58 = vrot.slane %v1088_v50, 6  ;;  %v1103_v40 = vrot.slane %v1088_v50, 7  ;;  %v3797_v50 = vld [vmem:[#allocation2 + $0x218] sm:$0xff] }
 0x304   :  { %v1019_v55 = vpop.f32.mrf.mxu0  ;;  %v1090_v3 = vpop.f32.mrf.mxu1 }
 0x305   :  { %v1113_v59 = vadd.f32 %v1097_v51, %v4532_v57  ;;  %v1117_v62 = vadd.f32 %v1101_v53, %v4533_v61  ;;  %v1098_v63 = vrot.slane %v1019_v55, 6  ;;  %v1102_v2 = vrot.slane %v1019_v55, 7 }
 0x306   :  { %v1115_v13 = vadd.f32 %v1099_v58, %v3601_v21  ;;  %v1119_v38 = vadd.f32 %v1103_v40, %v4534_v52  ;;  %v1100_v7 = vrot.slane %v1090_v3, 6  ;;  %v1104_v5 = vrot.slane %v1090_v3, 7  ;;  %v3812_v58 = vld [vmem:[#allocation2 + $0x1e0] sm:$0xff]  ;;  %v3815_v40 = vld [vmem:[#allocation2 + $0x1f0] sm:$0xff]  ;;  %v3818_v3 = vld [vmem:[#allocation2 + $0x1c8] sm:$0xff] }
 0x307   :  { %v2725_v23 = vmul.f32 -1.442695, %v1113_v59  ;;  %v2728_v44 = vmul.f32 -1.442695, %v1117_v62  ;;  %v1114_v60 = vadd.f32 %v1098_v63, %v4505_v15  ;;  %v1118_v56 = vadd.f32 %v1102_v2, %v3596_v36  ;;  %v3788_v2 = vld [vmem:[#allocation2 + $0x220] sm:$0xff] }
 0x308   :  { %v2727_v4 = vmul.f32 -1.442695, %v1115_v13  ;;  %v2730_v17 = vmul.f32 -1.442695, %v1119_v38  ;;  %v1116_v46 = vadd.f32 %v1100_v7, %v4535_v48  ;;  %v1120_v6 = vadd.f32 %v1104_v5, %v4536_v54  ;;  %v3821_v13 = vld [vmem:[#allocation2 + $0x1d8] sm:$0xff]  ;;  %v3824_v38 = vld [vmem:[#allocation2 + $0x1c0] sm:$0xff] }
 0x309   :  { %2936 = vpow2.f32 %v2725_v23  ;;  %v2726_v0 = vmul.f32 -1.442695, %v1114_v60  ;;  %v2729_v1 = vmul.f32 -1.442695, %v1118_v56  ;;  %v3791_v23 = vld [vmem:[#allocation2 + $0x230] sm:$0xff]  ;;  %v3800_v60 = vld [vmem:[#allocation2 + $0x200] sm:$0xff] }
 0x30a   :  { %2938 = vpow2.f32 %v2728_v44  ;;  %v3794_v44 = vld [vmem:[#allocation2 + $0x208] sm:$0xff]  ;;  %v3803_v56 = vld [vmem:[#allocation2 + $0x210] sm:$0xff] }
 0x30b   :  { %2940 = vpow2.f32 %v2726_v0  ;;  %v3806_v0 = vld [vmem:[#allocation2 + $0x1e8] sm:$0xff]  ;;  %v3827_v7 = vld [vmem:[#allocation2 + $0x1d0] sm:$0xff] }
 0x30c   :  { %2942 = vpow2.f32 %v2729_v1  ;;  %v3809_v1 = vld [vmem:[#allocation2 + $0x1f8] sm:$0xff]  ;;  %v3830_v5 = vld [vmem:[#allocation2 + $0x1a8] sm:$0xff] }
 0x30d   :  { %2944 = vpow2.f32 %v2727_v4  ;;  %v3833_v4 = vld [vmem:[#allocation2 + $0x1b8] sm:$0xff] }
 0x30e   :  { %2946 = vpow2.f32 %v2730_v17  ;;  %v3836_v17 = vld [vmem:[#allocation2 + $0x1a0] sm:$0xff] }
 0x30f   :  { %2948 = vtanh.f32 %v1116_v46  ;;  %v3839_v46 = vld [vmem:[#allocation2 + $0x1b0] sm:$0xff] }
 0x310   :  { %2950 = vtanh.f32 %v1120_v6  ;;  %v3845_v6 = vld [vmem:[#allocation2 + $0x198] sm:$0xff] }
 0x316   :  { %v2937_v11 = vpop.eup %2936 }
 0x317   :  { %v2939_v9 = vpop.eup %2938  ;;  %v1139_v8 = vadd.f32 1.0, %v2937_v11  ;;  %v3842_v11 = vld [vmem:[#allocation2 + $0x188] sm:$0xff] }
 0x318   :  { %v1142_v10 = vadd.f32 1.0, %v2939_v9  ;;  %v2941_v12 = vpop.eup %2940  ;;  %v3848_v9 = vld [vmem:[#allocation2 + $0x180] sm:$0xff] }
 0x319   :  { %v2943_v14 = vpop.eup %2942  ;;  %2952 = vrcp.f32 %v1139_v8  ;;  %v1140_v16 = vadd.f32 1.0, %v2941_v12  ;;  %v3851_v8 = vld [vmem:[#allocation2 + $0x190] sm:$0xff]  ;;  %v3857_v12 = vld [vmem:[#allocation2 + $0x178] sm:$0xff] }
 0x31a   :  { %2954 = vrcp.f32 %v1142_v10  ;;  %v1143_v18 = vadd.f32 1.0, %v2943_v14  ;;  %v2945_v19 = vpop.eup %2944  ;;  %v3854_v10 = vld [vmem:[#allocation2 + $0x168] sm:$0xff]  ;;  %v3860_v14 = vld [vmem:[#allocation2 + $0x160] sm:$0xff] }
 0x31b   :  { %2956 = vrcp.f32 %v1140_v16  ;;  %v2947_v22 = vpop.eup %2946  ;;  %v1141_v29 = vadd.f32 1.0, %v2945_v19  ;;  %v3863_v16 = vld [vmem:[#allocation2 + $0x170] sm:$0xff]  ;;  %v3869_v19 = vld [vmem:[#allocation2 + $0x158] sm:$0xff] }
 0x31c   :  { %2958 = vrcp.f32 %v1143_v18  ;;  %v2949_v24 = vpop.eup %2948  ;;  %v1144_v32 = vadd.f32 1.0, %v2947_v22  ;;  %v3866_v18 = vld [vmem:[#allocation2 + $0x148] sm:$0xff]  ;;  %v3872_v22 = vld [vmem:[#allocation2 + $0x140] sm:$0xff] }
 0x31d   :  { %v2951_v25 = vpop.eup %2950  ;;  %2960 = vrcp.f32 %v1141_v29  ;;  %v3890_v29 = vld [vmem:[#allocation2 + $0x108] sm:$0xff] }
 0x31e   :  { %2962 = vrcp.f32 %v1144_v32  ;;  %v3899_v32 = vld [vmem:[#allocation2 + $0x110] sm:$0xff] }
 0x326   :  { %v2953_v26 = vpop.eup %2952 }
 0x327   :  { %v2955_v27 = vpop.eup %2954  ;;  %v1167_v35 = vmul.f32 %v2953_v26, %v2949_v24  ;;  %v3875_v24 = vld [vmem:[#allocation2 + $0x150] sm:$0xff]  ;;  %v3881_v26 = vld [vmem:[#allocation2 + $0x138] sm:$0xff] }
 0x328   :  { %v2957_v30 = vpop.eup %2956  ;;  %v1168_v39 = vmul.f32 %v2955_v27, %v2951_v25  ;;  %v3878_v25 = vld [vmem:[#allocation2 + $0x128] sm:$0xff]  ;;  %v3884_v27 = vld [vmem:[#allocation2 + $0x120] sm:$0xff] }
 0x329   :  { %v2959_v33 = vpop.eup %2958  ;;  %v1165_v34 = vmul.f32 %v2957_v30, %v1161_v28  ;;  %v3887_v28 = vld [vmem:[#allocation2 + $0x130] sm:$0xff]  ;;  %v3893_v30 = vld [vmem:[#allocation2 + $0x118] sm:$0xff] }
 0x32a   :  { %v1166_v37 = vmul.f32 %v2959_v33, %v1162_v31  ;;  %v2961_v20 = vpop.eup %2960  ;;  %v3896_v31 = vld [vmem:[#allocation2 + $0x100] sm:$0xff]  ;;  %v3902_v33 = vld [vmem:[#allocation2 + $0xe8] sm:$0xff] }
 0x32b   :  { %v3781_v43 = vadd.f32 %v1167_v35, %v1165_v34  ;;  %v2963_v49 = vpop.eup %2962  ;;  %4537 = vst [vmem:[#allocation11_spill] sm:$0xff] %v3902_v33  ;;  %v3905_v34 = vld [vmem:[#allocation2 + $0xf8] sm:$0xff]  ;;  %v3908_v35 = vld [vmem:[#allocation2 + $0xe0] sm:$0xff] }
 0x32c   :  { %v3783_v47 = vadd.f32 %v1168_v39, %v1166_v37  ;;  %4538 = vst [vmem:[#allocation24_spill] sm:$0xff] %v3905_v34  ;;  %4539 = vst [vmem:[#allocation12_spill] sm:$0xff] %v3908_v35  ;;  %v3911_v37 = vld [vmem:[#allocation2 + $0xf0] sm:$0xff]  ;;  %v3914_v39 = vld [vmem:[#allocation2 + $0xc8] sm:$0xff] }
 0x32d   :  { %2964 = vtanh.f32 %v3781_v43  ;;  %4540 = vst [vmem:[#allocation8_spill] sm:$0xff] %v3911_v37  ;;  %4541 = vst [vmem:[#allocation25_spill] sm:$0xff] %v3914_v39 }
 0x32e   :  { %2966 = vtanh.f32 %v3783_v47 }
 0x33a   :  { %v2965_v51 = vpop.eup %2964 }
 0x33b   :  { %v2967_v42 = vpop.eup %2966  ;;  %v1173_v53 = vmul.f32 %v2965_v51, %v2961_v20  ;;  %v3917_v20 = vld [vmem:[#allocation2 + $0xd8] sm:$0xff]  ;;  %v3923_v51 = vld [vmem:[#allocation2 + $0xd0] sm:$0xff] }
 0x33c   :  { %v1174_v55 = vmul.f32 %v2967_v42, %v2963_v49  ;;  %4542 = vst [vmem:[#allocation13_spill] sm:$0xff] %v3917_v20  ;;  %v3920_v49 = vld [vmem:[#allocation2 + $0xc0] sm:$0xff]  ;;  %4544 = vst [vmem:[#allocation14_spill] sm:$0xff] %v3923_v51  ;;  %v3926_v42 = vld [vmem:[#allocation2 + $0xa8] sm:$0xff] }
 0x33d   :  { %v1177_v59 = vrot.slane %v1173_v53, 2  ;;  %4543 = vst [vmem:[#allocation26_spill] sm:$0xff] %v3920_v49  ;;  %4545 = vst [vmem:[#allocation27_spill] sm:$0xff] %v3926_v42  ;;  %v3929_v53 = vld [vmem:[#allocation2 + $0xb8] sm:$0xff] }
 0x33e   :  { %v1178_v62 = vrot.slane %v1174_v55, 1  ;;  %4546 = vst [vmem:[#allocation15_spill] sm:$0xff] %v3929_v53  ;;  %v3932_v55 = vld [vmem:[#allocation2 + $0xa0] sm:$0xff] }
 0x33f   :  { %4547 = vst [vmem:[#allocation28_spill] sm:$0xff] %v3932_v55 }
 0x340   :  { %v1179_v63 = vsel %vm723_vm4, %v1178_v62, %v1177_v59  ;;  %v3935_v59 = vld [vmem:[#allocation2 + $0xb0] sm:$0xff]  ;;  %v3938_v62 = vld [vmem:[#allocation2 + $0x88] sm:$0xff] }
 0x341   :  { %1246 = vmatmul.mubr.f32.vlgmr.msra.gmra.mxu0 %v1179_v63  ;;  %1317 = vmatmul.mubr.f32.vlgmr.msra.gmra.mxu1 %v1179_v63  ;;  %4548 = vst [vmem:[#allocation16_spill] sm:$0xff] %v3935_v59  ;;  %4549 = vst [vmem:[#allocation29_spill] sm:$0xff] %v3938_v62  ;;  %v3941_v63 = vld [vmem:[#allocation2 + $0x98] sm:$0xff] }
 0x342   :  { %1412 = vmatpush1.msra.mxu0 %v3788_v2  ;;  %1483 = vmatpush1.msra.mxu1 %v3791_v23  ;;  %4550 = vst [vmem:[#allocation17_spill] sm:$0xff] %v3941_v63 }
 0x343   :  { %1413 = vmatprep.subr.mxu0 %v3794_v44  ;;  %1484 = vmatprep.subr.mxu1 %v3797_v50 }
 0x344   :  { %1414 = vmatpush1.msra.mxu0 %v3800_v60  ;;  %1485 = vmatpush1.msra.mxu1 %v3803_v56 }
 0x345   :  { %1415 = vmatprep.subr.mxu0 %v3806_v0  ;;  %1486 = vmatprep.subr.mxu1 %v3809_v1 }
 0x346   :  { %1416 = vmatpush1.msra.mxu0 %v3812_v58  ;;  %1487 = vmatpush1.msra.mxu1 %v3815_v40 }
 0x347   :  { %1417 = vmatprep.subr.mxu0 %v3818_v3  ;;  %1488 = vmatprep.subr.mxu1 %v3821_v13 }
 0x348   :  { %1418 = vmatpush1.msra.mxu0 %v3824_v38  ;;  %1489 = vmatpush1.msra.mxu1 %v3827_v7 }
 0x349   :  { %1419 = vmatprep.subr.mxu0 %v3830_v5  ;;  %1490 = vmatprep.subr.mxu1 %v3833_v4 }
 0x34a   :  { %1420 = vmatpush1.msra.mxu0 %v3836_v17  ;;  %1491 = vmatpush1.msra.mxu1 %v3839_v46 }
 0x34b   :  { %1421 = vmatprep.subr.mxu0 %v3842_v11  ;;  %1492 = vmatprep.subr.mxu1 %v3845_v6 }
 0x34c   :  { %1422 = vmatpush1.msra.mxu0 %v3848_v9  ;;  %1493 = vmatpush1.msra.mxu1 %v3851_v8 }
 0x34d   :  { %1423 = vmatprep.subr.mxu0 %v3854_v10  ;;  %1494 = vmatprep.subr.mxu1 %v3857_v12 }
 0x34e   :  { %1424 = vmatpush1.msra.mxu0 %v3860_v14  ;;  %1495 = vmatpush1.msra.mxu1 %v3863_v16 }
 0x34f   :  { %1425 = vmatprep.subr.mxu0 %v3866_v18  ;;  %1496 = vmatprep.subr.mxu1 %v3869_v19 }
 0x350   :  { %1426 = vmatpush1.msra.mxu0 %v3872_v22  ;;  %1497 = vmatpush1.msra.mxu1 %v3875_v24 }
 0x351   :  { %1427 = vmatprep.subr.mxu0 %v3878_v25  ;;  %1498 = vmatprep.subr.mxu1 %v3881_v26 }
 0x352   :  { %1428 = vmatpush1.msra.mxu0 %v3884_v27  ;;  %1499 = vmatpush1.msra.mxu1 %v3887_v28 }
 0x353   :  { %1429 = vmatprep.subr.mxu0 %v3890_v29  ;;  %1500 = vmatprep.subr.mxu1 %v3893_v30 }
 0x354   :  { %1430 = vmatpush1.msra.mxu0 %v3896_v31  ;;  %1501 = vmatpush1.msra.mxu1 %v3899_v32 }
 0x355   :  { %1431 = vmatprep.subr.mxu0 %v3902_v33  ;;  %1502 = vmatprep.subr.mxu1 %v3905_v34 }
 0x356   :  { %1432 = vmatpush1.msra.mxu0 %v3908_v35  ;;  %1503 = vmatpush1.msra.mxu1 %v3911_v37 }
 0x357   :  { %1433 = vmatprep.subr.mxu0 %v3914_v39  ;;  %1504 = vmatprep.subr.mxu1 %v3917_v20 }
 0x358   :  { %1434 = vmatpush1.msra.mxu0 %v3920_v49  ;;  %1505 = vmatpush1.msra.mxu1 %v3923_v51 }
 0x359   :  { %1435 = vmatprep.subr.mxu0 %v3926_v42  ;;  %1506 = vmatprep.subr.mxu1 %v3929_v53  ;;  %v3944_v42 = vld [vmem:[#allocation2 + $0x80] sm:$0xff]  ;;  %v3947_v53 = vld [vmem:[#allocation2 + $0x90] sm:$0xff] }
 0x35a   :  { %1436 = vmatpush1.msra.mxu0 %v3932_v55  ;;  %1507 = vmatpush1.msra.mxu1 %v3935_v59  ;;  %4551 = vst [vmem:[#allocation30_spill] sm:$0xff] %v3944_v42  ;;  %4552 = vst [vmem:[#allocation18_spill] sm:$0xff] %v3947_v53  ;;  %v3950_v55 = vld [vmem:[#allocation2 + $0x68] sm:$0xff]  ;;  %v3953_v59 = vld [vmem:[#allocation2 + $0x78] sm:$0xff] }
 0x35b   :  { %1437 = vmatprep.subr.mxu0 %v3938_v62  ;;  %1508 = vmatprep.subr.mxu1 %v3941_v63  ;;  %4553 = vst [vmem:[#allocation31_spill] sm:$0xff] %v3950_v55  ;;  %4554 = vst [vmem:[#allocation19_spill] sm:$0xff] %v3953_v59  ;;  %v3956_v62 = vld [vmem:[#allocation2 + $0x60] sm:$0xff]  ;;  %v3959_v63 = vld [vmem:[#allocation2 + $0x70] sm:$0xff] }
 0x35c   :  { %1438 = vmatpush1.msra.mxu0 %v3944_v42  ;;  %1509 = vmatpush1.msra.mxu1 %v3947_v53  ;;  %4555 = vst [vmem:[#allocation32_spill] sm:$0xff] %v3956_v62  ;;  %4556 = vst [vmem:[#allocation20_spill] sm:$0xff] %v3959_v63  ;;  %v3962_v42 = vld [vmem:[#allocation2 + $0x48] sm:$0xff]  ;;  %v3965_v53 = vld [vmem:[#allocation2 + $0x58] sm:$0xff] }
 0x35d   :  { %1439 = vmatprep.subr.mxu0 %v3950_v55  ;;  %1510 = vmatprep.subr.mxu1 %v3953_v59  ;;  %4557 = vst [vmem:[#allocation33_spill] sm:$0xff] %v3962_v42  ;;  %4558 = vst [vmem:[#allocation21_spill] sm:$0xff] %v3965_v53  ;;  %v3968_v55 = vld [vmem:[#allocation2 + $0x40] sm:$0xff]  ;;  %v3972_v59 = vld [vmem:[#allocation2 + $0x50] sm:$0xff] }
 0x35e   :  { %1440 = vmatpush1.msra.mxu0 %v3956_v62  ;;  %1511 = vmatpush1.msra.mxu1 %v3959_v63  ;;  %4559 = vst [vmem:[#allocation34_spill] sm:$0xff] %v3968_v55  ;;  %4560 = vst [vmem:[#allocation22_spill] sm:$0xff] %v3972_v59  ;;  %v3977_v63 = vld [vmem:[#allocation2 + $0x238] sm:$0xff] }
 0x35f   :  { %1441 = vmatprep.subr.mxu0 %v3962_v42  ;;  %1512 = vmatprep.subr.mxu1 %v3965_v53  ;;  %4561 = vst [vmem:[#allocation35_spill] sm:$0xff] %v3977_v63 }
 0x360   :  { %1442 = vmatpush1.msra.mxu0 %v3968_v55  ;;  %1475 = vmatprep.mubr.f32.mxu0 %v4528_v41 }
 0x361   :  { %1513 = vmatpush1.msra.mxu1 %v3972_v59  ;;  %1546 = vmatprep.mubr.f32.mxu1 %v4528_v41 }
 0x362   :  { %1641 = vmatprep.subr.mxu0 %v3767_v45  ;;  %1712 = vmatprep.subr.mxu1 %v3977_v63 }
 0x401   :  { %v1247_v42 = vpop.f32.mrf.mxu0  ;;  %v1318_v35 = vpop.f32.mrf.mxu1 }
 0x402   :  { %v1327_v53 = vrot.slane %v1247_v42, 5  ;;  %v1331_v62 = vrot.slane %v1247_v42, 6  ;;  %v1329_v33 = vrot.slane %v1318_v35, 5  ;;  %v1333_v42 = vrot.slane %v1318_v35, 6 }
 0x403   :  { %v1249_v51 = vpop.f32.mrf.mxu0 }
 0x404   :  { %v1343_v55 = vadd.f32 %v1327_v53, %v4532_v57  ;;  %v1347_v49 = vadd.f32 %v1331_v62, %v4533_v61  ;;  %v1328_v20 = vrot.slane %v1249_v51, 5  ;;  %v1332_v39 = vrot.slane %v1249_v51, 6  ;;  %v1320_v53 = vpop.f32.mrf.mxu1 }
 0x405   :  { %v1345_v62 = vadd.f32 %v1329_v33, %v3601_v21  ;;  %v1349_v51 = vadd.f32 %v1333_v42, %v4534_v52 }
 0x406   :  { %v2731_v37 = vmul.f32 -1.442695, %v1343_v55  ;;  %v2734_v59 = vmul.f32 -1.442695, %v1347_v49  ;;  %v1344_v41 = vadd.f32 %v1328_v20, %v4505_v15  ;;  %v1348_v45 = vadd.f32 %v1332_v39, %v3596_v36 }
 0x407   :  { %v1330_v55 = vrot.slane %v1320_v53, 5  ;;  %v1334_v49 = vrot.slane %v1320_v53, 6  ;;  %v2733_v61 = vmul.f32 -1.442695, %v1345_v62  ;;  %v2736_v57 = vmul.f32 -1.442695, %v1349_v51 }
 0x408   :  { %2968 = vpow2.f32 %v2731_v37  ;;  %v2732_v63 = vmul.f32 -1.442695, %v1344_v41  ;;  %v2735_v34 = vmul.f32 -1.442695, %v1348_v45 }
 0x409   :  { %2970 = vpow2.f32 %v2734_v59  ;;  %v1346_v20 = vadd.f32 %v1330_v55, %v4535_v48  ;;  %v1350_v37 = vadd.f32 %v1334_v49, %v4536_v54 }
 0x40a   :  { %2972 = vpow2.f32 %v2732_v63 }
 0x40b   :  { %2974 = vpow2.f32 %v2735_v34 }
 0x40c   :  { %2976 = vpow2.f32 %v2733_v61  ;;  %v1391_v61 = vrot.slane %v3781_v43, 7 }
 0x40d   :  { %2978 = vpow2.f32 %v2736_v57 }
 0x40e   :  { %2980 = vtanh.f32 %v1346_v20  ;;  %v1392_v20 = vrot.slane %v3783_v47, 7 }
 0x40f   :  { %2982 = vtanh.f32 %v1350_v37 }
 0x415   :  { %v2969_v39 = vpop.eup %2968 }
 0x416   :  { %v2971_v41 = vpop.eup %2970  ;;  %v1369_v45 = vadd.f32 1.0, %v2969_v39 }
 0x417   :  { %v1372_v35 = vadd.f32 1.0, %v2971_v41  ;;  %v2973_v34 = vpop.eup %2972 }
 0x418   :  { %v2975_v33 = vpop.eup %2974  ;;  %2984 = vrcp.f32 %v1369_v45  ;;  %v1370_v59 = vadd.f32 1.0, %v2973_v34 }
 0x419   :  { %2986 = vrcp.f32 %v1372_v35  ;;  %v1373_v63 = vadd.f32 1.0, %v2975_v33  ;;  %v2977_v42 = vpop.eup %2976 }
 0x41a   :  { %2988 = vrcp.f32 %v1370_v59  ;;  %v2979_v53 = vpop.eup %2978  ;;  %v1371_v39 = vadd.f32 1.0, %v2977_v42 }
 0x41b   :  { %2990 = vrcp.f32 %v1373_v63  ;;  %v2981_v62 = vpop.eup %2980  ;;  %v1374_v37 = vadd.f32 1.0, %v2979_v53 }
 0x41c   :  { %v2983_v51 = vpop.eup %2982  ;;  %2992 = vrcp.f32 %v1371_v39  ;;  %v4566_v39 = vld [vmem:[#allocation25_spill] sm:$0xff] }
 0x41d   :  { %2994 = vrcp.f32 %v1374_v37  ;;  %v4569_v37 = vld [vmem:[#allocation14_spill] sm:$0xff] }
 0x425   :  { %v2985_v55 = vpop.eup %2984 }
 0x426   :  { %v2987_v49 = vpop.eup %2986  ;;  %v1397_v34 = vmul.f32 %v2985_v55, %v2981_v62  ;;  %v4564_v55 = vld [vmem:[#allocation12_spill] sm:$0xff] }
 0x427   :  { %v2989_v57 = vpop.eup %2988  ;;  %v1398_v33 = vmul.f32 %v2987_v49, %v2983_v51  ;;  %v4565_v49 = vld [vmem:[#allocation8_spill] sm:$0xff] }
 0x428   :  { %v2991_v41 = vpop.eup %2990  ;;  %v1395_v45 = vmul.f32 %v2989_v57, %v1391_v61  ;;  %v4567_v57 = vld [vmem:[#allocation13_spill] sm:$0xff] }
 0x429   :  { %v1396_v35 = vmul.f32 %v2991_v41, %v1392_v20  ;;  %v2993_v43 = vpop.eup %2992  ;;  %v4568_v20 = vld [vmem:[#allocation26_spill] sm:$0xff]  ;;  %v4570_v41 = vld [vmem:[#allocation27_spill] sm:$0xff] }
 0x42a   :  { %v3990_v59 = vadd.f32 %v1397_v34, %v1395_v45  ;;  %v2995_v42 = vpop.eup %2994  ;;  %v4571_v45 = vld [vmem:[#allocation15_spill] sm:$0xff]  ;;  %v4572_v34 = vld [vmem:[#allocation28_spill] sm:$0xff] }
 0x42b   :  { %v3992_v63 = vadd.f32 %v1398_v33, %v1396_v35  ;;  %v4573_v35 = vld [vmem:[#allocation16_spill] sm:$0xff]  ;;  %v4574_v33 = vld [vmem:[#allocation29_spill] sm:$0xff] }
 0x42c   :  { %2996 = vtanh.f32 %v3990_v59 }
 0x42d   :  { %2998 = vtanh.f32 %v3992_v63 }
 0x439   :  { %v2997_v54 = vpop.eup %2996 }
 0x43a   :  { %v2999_v47 = vpop.eup %2998  ;;  %v1403_v53 = vmul.f32 %v2997_v54, %v2993_v43  ;;  %v4563_v54 = vld [vmem:[#allocation24_spill] sm:$0xff]  ;;  %v4575_v43 = vld [vmem:[#allocation17_spill] sm:$0xff] }
 0x43b   :  { %v1404_v48 = vmul.f32 %v2999_v47, %v2995_v42  ;;  %v4576_v42 = vld [vmem:[#allocation30_spill] sm:$0xff] }
 0x43c   :  { %v1407_v61 = vrot.slane %v1403_v53, 3  ;;  %v4577_v47 = vld [vmem:[#allocation18_spill] sm:$0xff]  ;;  %v4578_v53 = vld [vmem:[#allocation31_spill] sm:$0xff] }
 0x43d   :  { %v1408_v62 = vrot.slane %v1404_v48, 2  ;;  %v4562_v48 = vld [vmem:[#allocation11_spill] sm:$0xff] }
 0x43f   :  { %v1409_v51 = vsel %vm723_vm4, %v1408_v62, %v1407_v61  ;;  %v4579_v61 = vld [vmem:[#allocation19_spill] sm:$0xff]  ;;  %v4580_v62 = vld [vmem:[#allocation32_spill] sm:$0xff] }
 0x440   :  { %1476 = vmatmul.mubr.f32.vlgmr.msra.gmra.mxu0 %v1409_v51  ;;  %1547 = vmatmul.mubr.f32.vlgmr.msra.gmra.mxu1 %v1409_v51  ;;  %v4581_v51 = vld [vmem:[#allocation20_spill] sm:$0xff] }
 0x441   :  { %1642 = vmatpush1.msra.mxu0 %v3788_v2  ;;  %1713 = vmatpush1.msra.mxu1 %v3791_v23 }
 0x442   :  { %1643 = vmatprep.subr.mxu0 %v3794_v44  ;;  %1714 = vmatprep.subr.mxu1 %v3797_v50 }
 0x443   :  { %1644 = vmatpush1.msra.mxu0 %v3800_v60  ;;  %1715 = vmatpush1.msra.mxu1 %v3803_v56 }
 0x444   :  { %1645 = vmatprep.subr.mxu0 %v3806_v0  ;;  %1716 = vmatprep.subr.mxu1 %v3809_v1 }
 0x445   :  { %1646 = vmatpush1.msra.mxu0 %v3812_v58  ;;  %1717 = vmatpush1.msra.mxu1 %v3815_v40 }
 0x446   :  { %1647 = vmatprep.subr.mxu0 %v3818_v3  ;;  %1718 = vmatprep.subr.mxu1 %v3821_v13 }
 0x447   :  { %1648 = vmatpush1.msra.mxu0 %v3824_v38  ;;  %1719 = vmatpush1.msra.mxu1 %v3827_v7 }
 0x448   :  { %1649 = vmatprep.subr.mxu0 %v3830_v5  ;;  %1720 = vmatprep.subr.mxu1 %v3833_v4 }
 0x449   :  { %1650 = vmatpush1.msra.mxu0 %v3836_v17  ;;  %1721 = vmatpush1.msra.mxu1 %v3839_v46 }
 0x44a   :  { %1651 = vmatprep.subr.mxu0 %v3842_v11  ;;  %1722 = vmatprep.subr.mxu1 %v3845_v6 }
 0x44b   :  { %1652 = vmatpush1.msra.mxu0 %v3848_v9  ;;  %1723 = vmatpush1.msra.mxu1 %v3851_v8 }
 0x44c   :  { %1653 = vmatprep.subr.mxu0 %v3854_v10  ;;  %1724 = vmatprep.subr.mxu1 %v3857_v12 }
 0x44d   :  { %1654 = vmatpush1.msra.mxu0 %v3860_v14  ;;  %1725 = vmatpush1.msra.mxu1 %v3863_v16 }
 0x44e   :  { %1655 = vmatprep.subr.mxu0 %v3866_v18  ;;  %1726 = vmatprep.subr.mxu1 %v3869_v19 }
 0x44f   :  { %1656 = vmatpush1.msra.mxu0 %v3872_v22  ;;  %1727 = vmatpush1.msra.mxu1 %v3875_v24 }
 0x450   :  { %1657 = vmatprep.subr.mxu0 %v3878_v25  ;;  %1728 = vmatprep.subr.mxu1 %v3881_v26 }
 0x451   :  { %1658 = vmatpush1.msra.mxu0 %v3884_v27  ;;  %1729 = vmatpush1.msra.mxu1 %v3887_v28 }
 0x452   :  { %1659 = vmatprep.subr.mxu0 %v3890_v29  ;;  %1730 = vmatprep.subr.mxu1 %v3893_v30 }
 0x453   :  { %1660 = vmatpush1.msra.mxu0 %v3896_v31  ;;  %1731 = vmatpush1.msra.mxu1 %v3899_v32 }
 0x454   :  { %1661 = vmatprep.subr.mxu0 %v4562_v48  ;;  %1732 = vmatprep.subr.mxu1 %v4563_v54 }
 0x455   :  { %1662 = vmatpush1.msra.mxu0 %v4564_v55  ;;  %1733 = vmatpush1.msra.mxu1 %v4565_v49 }
 0x456   :  { %1663 = vmatprep.subr.mxu0 %v4566_v39  ;;  %1734 = vmatprep.subr.mxu1 %v4567_v57 }
 0x457   :  { %1664 = vmatpush1.msra.mxu0 %v4568_v20  ;;  %1735 = vmatpush1.msra.mxu1 %v4569_v37  ;;  %v4590_v37 = vld [vmem:[#allocation39_spill] sm:$0xff] }
 0x458   :  { %1665 = vmatprep.subr.mxu0 %v4570_v41  ;;  %1736 = vmatprep.subr.mxu1 %v4571_v45  ;;  %v4582_v45 = vld [vmem:[#allocation33_spill] sm:$0xff] }
 0x459   :  { %1666 = vmatpush1.msra.mxu0 %v4572_v34  ;;  %1737 = vmatpush1.msra.mxu1 %v4573_v35  ;;  %v4583_v34 = vld [vmem:[#allocation21_spill] sm:$0xff]  ;;  %v4584_v35 = vld [vmem:[#allocation34_spill] sm:$0xff] }
 0x45a   :  { %1667 = vmatprep.subr.mxu0 %v4574_v33  ;;  %1738 = vmatprep.subr.mxu1 %v4575_v43  ;;  %v4585_v33 = vmov 0.0   ;;  %v4586_v43 = vld [vmem:[#allocation22_spill] sm:$0xff]  ;;  %v4589_v41 = vld [vmem:[#allocation37_spill] sm:$0xff] }
 0x45b   :  { %1668 = vmatpush1.msra.mxu0 %v4576_v42  ;;  %1739 = vmatpush1.msra.mxu1 %v4577_v47  ;;  %v4587_v47 = vld [vmem:[#allocation9_spill] sm:$0xff] }
 0x45c   :  { %1669 = vmatprep.subr.mxu0 %v4578_v53  ;;  %1740 = vmatprep.subr.mxu1 %v4579_v61  ;;  %v4588_v53 = vld [vmem:[#allocation35_spill] sm:$0xff] }
 0x45d   :  { %1670 = vmatpush1.msra.mxu0 %v4580_v62  ;;  %1741 = vmatpush1.msra.mxu1 %v4581_v51 }
 0x45e   :  { %1671 = vmatprep.subr.mxu0 %v4582_v45  ;;  %1742 = vmatprep.subr.mxu1 %v4583_v34 }
 0x45f   :  { %1672 = vmatpush1.msra.mxu0 %v4584_v35  ;;  %1705 = vmatprep.mubr.f32.mxu0 %v4585_v33 }
 0x460   :  { %1743 = vmatpush1.msra.mxu1 %v4586_v43  ;;  %1776 = vmatprep.mubr.f32.mxu1 %v4585_v33 }
 0x461   :  { %1871 = vmatprep.subr.mxu0 %v4587_v47  ;;  %1942 = vmatprep.subr.mxu1 %v4588_v53 }
 0x500   :  { %v1477_v61 = vpop.f32.mrf.mxu0  ;;  %v1548_v49 = vpop.f32.mrf.mxu1 }
 0x501   :  { %v1557_v62 = vrot.slane %v1477_v61, 4  ;;  %v1561_v42 = vrot.slane %v1477_v61, 5  ;;  %v1559_v55 = vrot.slane %v1548_v49, 4  ;;  %v1563_v61 = vrot.slane %v1548_v49, 5 }
 0x502   :  { %v1479_v51 = vpop.f32.mrf.mxu0 }
 0x503   :  { %v1573_v45 = vadd.f32 %v1557_v62, %v4589_v41  ;;  %v1577_v34 = vadd.f32 %v1561_v42, %v4590_v37  ;;  %v1558_v20 = vrot.slane %v1479_v51, 4  ;;  %v1562_v35 = vrot.slane %v1479_v51, 5  ;;  %v1550_v62 = vpop.f32.mrf.mxu1 }
 0x504   :  { %v1575_v42 = vadd.f32 %v1559_v55, %v3601_v21  ;;  %v1579_v51 = vadd.f32 %v1563_v61, %v4534_v52 }
 0x505   :  { %v2737_v57 = vmul.f32 -1.442695, %v1573_v45  ;;  %v2740_v39 = vmul.f32 -1.442695, %v1577_v34  ;;  %v1574_v43 = vadd.f32 %v1558_v20, %v4505_v15  ;;  %v1578_v33 = vadd.f32 %v1562_v35, %v3596_v36  ;;  %v4591_v20 = vld [vmem:[#allocation41_spill] sm:$0xff] }
 0x506   :  { %v1560_v45 = vrot.slane %v1550_v62, 4  ;;  %v1564_v34 = vrot.slane %v1550_v62, 5  ;;  %v2739_v37 = vmul.f32 -1.442695, %v1575_v42  ;;  %v2742_v41 = vmul.f32 -1.442695, %v1579_v51 }
 0x507   :  { %3000 = vpow2.f32 %v2737_v57  ;;  %v2738_v53 = vmul.f32 -1.442695, %v1574_v43  ;;  %v2741_v47 = vmul.f32 -1.442695, %v1578_v33  ;;  %v4592_v57 = vld [vmem:[#allocation42_spill] sm:$0xff] }
 0x508   :  { %3002 = vpow2.f32 %v2740_v39  ;;  %v1576_v15 = vadd.f32 %v1560_v45, %v4591_v20  ;;  %v1580_v39 = vadd.f32 %v1564_v34, %v4592_v57 }
 0x509   :  { %3004 = vpow2.f32 %v2738_v53 }
 0x50a   :  { %3006 = vpow2.f32 %v2741_v47 }
 0x50b   :  { %3008 = vpow2.f32 %v2739_v37  ;;  %v1621_v37 = vrot.slane %v3990_v59, 7 }
 0x50c   :  { %3010 = vpow2.f32 %v2742_v41 }
 0x50d   :  { %3012 = vtanh.f32 %v1576_v15  ;;  %v1622_v15 = vrot.slane %v3992_v63, 7 }
 0x50e   :  { %3014 = vtanh.f32 %v1580_v39 }
 0x514   :  { %v3001_v35 = vpop.eup %3000 }
 0x515   :  { %v3003_v43 = vpop.eup %3002  ;;  %v1599_v33 = vadd.f32 1.0, %v3001_v35 }
 0x516   :  { %v1602_v49 = vadd.f32 1.0, %v3003_v43  ;;  %v3005_v47 = vpop.eup %3004 }
 0x517   :  { %v3007_v55 = vpop.eup %3006  ;;  %3016 = vrcp.f32 %v1599_v33  ;;  %v1600_v53 = vadd.f32 1.0, %v3005_v47 }
 0x518   :  { %3018 = vrcp.f32 %v1602_v49  ;;  %v1603_v61 = vadd.f32 1.0, %v3007_v55  ;;  %v3009_v62 = vpop.eup %3008 }
 0x519   :  { %3020 = vrcp.f32 %v1600_v53  ;;  %v3011_v42 = vpop.eup %3010  ;;  %v1601_v35 = vadd.f32 1.0, %v3009_v62 }
 0x51a   :  { %3022 = vrcp.f32 %v1603_v61  ;;  %v3013_v51 = vpop.eup %3012  ;;  %v1604_v39 = vadd.f32 1.0, %v3011_v42 }
 0x51b   :  { %v3015_v45 = vpop.eup %3014  ;;  %3024 = vrcp.f32 %v1601_v35  ;;  %v4597_v35 = vld [vmem:[#allocation26_spill] sm:$0xff] }
 0x51c   :  { %3026 = vrcp.f32 %v1604_v39  ;;  %v4600_v39 = vld [vmem:[#allocation15_spill] sm:$0xff] }
 0x524   :  { %v3017_v34 = vpop.eup %3016 }
 0x525   :  { %v3019_v57 = vpop.eup %3018  ;;  %v1627_v47 = vmul.f32 %v3017_v34, %v3013_v51  ;;  %v4596_v34 = vld [vmem:[#allocation13_spill] sm:$0xff] }
 0x526   :  { %v3021_v41 = vpop.eup %3020  ;;  %v1628_v55 = vmul.f32 %v3019_v57, %v3015_v45  ;;  %v4595_v45 = vld [vmem:[#allocation25_spill] sm:$0xff] }
 0x527   :  { %v3023_v43 = vpop.eup %3022  ;;  %v1625_v33 = vmul.f32 %v3021_v41, %v1621_v37  ;;  %v4598_v41 = vld [vmem:[#allocation14_spill] sm:$0xff] }
 0x528   :  { %v1626_v49 = vmul.f32 %v3023_v43, %v1622_v15  ;;  %v3025_v59 = vpop.eup %3024  ;;  %v4599_v15 = vld [vmem:[#allocation27_spill] sm:$0xff]  ;;  %v4601_v43 = vld [vmem:[#allocation28_spill] sm:$0xff] }
 0x529   :  { %v4073_v53 = vadd.f32 %v1627_v47, %v1625_v33  ;;  %v3027_v62 = vpop.eup %3026  ;;  %v4602_v33 = vld [vmem:[#allocation16_spill] sm:$0xff]  ;;  %v4603_v47 = vld [vmem:[#allocation29_spill] sm:$0xff] }
 0x52a   :  { %v4075_v61 = vadd.f32 %v1628_v55, %v1626_v49  ;;  %v4604_v49 = vld [vmem:[#allocation17_spill] sm:$0xff]  ;;  %v4605_v55 = vld [vmem:[#allocation30_spill] sm:$0xff] }
 0x52b   :  { %3028 = vtanh.f32 %v4073_v53 }
 0x52c   :  { %3030 = vtanh.f32 %v4075_v61 }
 0x538   :  { %v3029_v20 = vpop.eup %3028 }
 0x539   :  { %v3031_v63 = vpop.eup %3030  ;;  %v1633_v42 = vmul.f32 %v3029_v20, %v3025_v59  ;;  %v4594_v20 = vld [vmem:[#allocation8_spill] sm:$0xff]  ;;  %v4606_v59 = vld [vmem:[#allocation18_spill] sm:$0xff] }
 0x53a   :  { %v1634_v52 = vmul.f32 %v3031_v63, %v3027_v62  ;;  %v4607_v62 = vld [vmem:[#allocation31_spill] sm:$0xff] }
 0x53b   :  { %v1637_v37 = vrot.slane %v1633_v42, 4  ;;  %v4608_v63 = vld [vmem:[#allocation19_spill] sm:$0xff]  ;;  %v4609_v42 = vld [vmem:[#allocation32_spill] sm:$0xff] }
 0x53c   :  { %v1638_v51 = vrot.slane %v1634_v52, 3  ;;  %v4593_v52 = vld [vmem:[#allocation12_spill] sm:$0xff] }
 0x53e   :  { %v1639_v57 = vsel %vm723_vm4, %v1638_v51, %v1637_v37  ;;  %v4610_v37 = vld [vmem:[#allocation20_spill] sm:$0xff]  ;;  %v4611_v51 = vld [vmem:[#allocation33_spill] sm:$0xff] }
 0x53f   :  { %1706 = vmatmul.mubr.f32.vlgmr.msra.gmra.mxu0 %v1639_v57  ;;  %1777 = vmatmul.mubr.f32.vlgmr.msra.gmra.mxu1 %v1639_v57  ;;  %v4612_v57 = vld [vmem:[#allocation21_spill] sm:$0xff] }
 0x540   :  { %1872 = vmatpush1.msra.mxu0 %v3788_v2  ;;  %1943 = vmatpush1.msra.mxu1 %v3791_v23 }
 0x541   :  { %1873 = vmatprep.subr.mxu0 %v3794_v44  ;;  %1944 = vmatprep.subr.mxu1 %v3797_v50 }
 0x542   :  { %1874 = vmatpush1.msra.mxu0 %v3800_v60  ;;  %1945 = vmatpush1.msra.mxu1 %v3803_v56 }
 0x543   :  { %1875 = vmatprep.subr.mxu0 %v3806_v0  ;;  %1946 = vmatprep.subr.mxu1 %v3809_v1 }
 0x544   :  { %1876 = vmatpush1.msra.mxu0 %v3812_v58  ;;  %1947 = vmatpush1.msra.mxu1 %v3815_v40 }
 0x545   :  { %1877 = vmatprep.subr.mxu0 %v3818_v3  ;;  %1948 = vmatprep.subr.mxu1 %v3821_v13 }
 0x546   :  { %1878 = vmatpush1.msra.mxu0 %v3824_v38  ;;  %1949 = vmatpush1.msra.mxu1 %v3827_v7 }
 0x547   :  { %1879 = vmatprep.subr.mxu0 %v3830_v5  ;;  %1950 = vmatprep.subr.mxu1 %v3833_v4 }
 0x548   :  { %1880 = vmatpush1.msra.mxu0 %v3836_v17  ;;  %1951 = vmatpush1.msra.mxu1 %v3839_v46 }
 0x549   :  { %1881 = vmatprep.subr.mxu0 %v3842_v11  ;;  %1952 = vmatprep.subr.mxu1 %v3845_v6 }
 0x54a   :  { %1882 = vmatpush1.msra.mxu0 %v3848_v9  ;;  %1953 = vmatpush1.msra.mxu1 %v3851_v8 }
 0x54b   :  { %1883 = vmatprep.subr.mxu0 %v3854_v10  ;;  %1954 = vmatprep.subr.mxu1 %v3857_v12 }
 0x54c   :  { %1884 = vmatpush1.msra.mxu0 %v3860_v14  ;;  %1955 = vmatpush1.msra.mxu1 %v3863_v16 }
 0x54d   :  { %1885 = vmatprep.subr.mxu0 %v3866_v18  ;;  %1956 = vmatprep.subr.mxu1 %v3869_v19 }
 0x54e   :  { %1886 = vmatpush1.msra.mxu0 %v3872_v22  ;;  %1957 = vmatpush1.msra.mxu1 %v3875_v24 }
 0x54f   :  { %1887 = vmatprep.subr.mxu0 %v3878_v25  ;;  %1958 = vmatprep.subr.mxu1 %v3881_v26 }
 0x550   :  { %1888 = vmatpush1.msra.mxu0 %v3884_v27  ;;  %1959 = vmatpush1.msra.mxu1 %v3887_v28 }
 0x551   :  { %1889 = vmatprep.subr.mxu0 %v3890_v29  ;;  %1960 = vmatprep.subr.mxu1 %v3893_v30 }
 0x552   :  { %1890 = vmatpush1.msra.mxu0 %v3896_v31  ;;  %1961 = vmatpush1.msra.mxu1 %v3899_v32 }
 0x553   :  { %1891 = vmatprep.subr.mxu0 %v4562_v48  ;;  %1962 = vmatprep.subr.mxu1 %v4563_v54 }
 0x554   :  { %1892 = vmatpush1.msra.mxu0 %v4593_v52  ;;  %1963 = vmatpush1.msra.mxu1 %v4594_v20 }
 0x555   :  { %1893 = vmatprep.subr.mxu0 %v4595_v45  ;;  %1964 = vmatprep.subr.mxu1 %v4596_v34 }
 0x556   :  { %1894 = vmatpush1.msra.mxu0 %v4597_v35  ;;  %1965 = vmatpush1.msra.mxu1 %v4598_v41 }
 0x557   :  { %1895 = vmatprep.subr.mxu0 %v4599_v15  ;;  %1966 = vmatprep.subr.mxu1 %v4600_v39  ;;  %v4619_v39 = vld [vmem:[#allocation39_spill] sm:$0xff] }
 0x558   :  { %1896 = vmatpush1.msra.mxu0 %v4601_v43  ;;  %1967 = vmatpush1.msra.mxu1 %v4602_v33  ;;  %v4613_v33 = vld [vmem:[#allocation34_spill] sm:$0xff]  ;;  %v4618_v43 = vld [vmem:[#allocation37_spill] sm:$0xff] }
 0x559   :  { %1897 = vmatprep.subr.mxu0 %v4603_v47  ;;  %1968 = vmatprep.subr.mxu1 %v4604_v49  ;;  %v4614_v47 = vmov 0.0   ;;  %v4615_v49 = vld [vmem:[#allocation22_spill] sm:$0xff] }
 0x55a   :  { %1898 = vmatpush1.msra.mxu0 %v4605_v55  ;;  %1969 = vmatpush1.msra.mxu1 %v4606_v59  ;;  %v4616_v59 = vld [vmem:[#allocation9_spill] sm:$0xff] }
 0x55b   :  { %1899 = vmatprep.subr.mxu0 %v4607_v62  ;;  %1970 = vmatprep.subr.mxu1 %v4608_v63  ;;  %v4617_v62 = vld [vmem:[#allocation35_spill] sm:$0xff] }
 0x55c   :  { %1900 = vmatpush1.msra.mxu0 %v4609_v42  ;;  %1971 = vmatpush1.msra.mxu1 %v4610_v37 }
 0x55d   :  { %1901 = vmatprep.subr.mxu0 %v4611_v51  ;;  %1972 = vmatprep.subr.mxu1 %v4612_v57 }
 0x55e   :  { %1902 = vmatpush1.msra.mxu0 %v4613_v33  ;;  %1935 = vmatprep.mubr.f32.mxu0 %v4614_v47 }
 0x55f   :  { %1973 = vmatpush1.msra.mxu1 %v4615_v49  ;;  %2006 = vmatprep.mubr.f32.mxu1 %v4614_v47  ;;  %v4620_v49 = vld [vmem:[#allocation38_spill] sm:$0xff] }
 0x560   :  { %2101 = vmatprep.subr.mxu0 %v4616_v59  ;;  %2172 = vmatprep.subr.mxu1 %v4617_v62 }
 0x5ff   :  { %v1707_v63 = vpop.f32.mrf.mxu0  ;;  %v1778_v34 = vpop.f32.mrf.mxu1 }
 0x600   :  { %v1787_v42 = vrot.slane %v1707_v63, 3  ;;  %v1791_v55 = vrot.slane %v1707_v63, 4  ;;  %v1789_v20 = vrot.slane %v1778_v34, 3  ;;  %v1793_v63 = vrot.slane %v1778_v34, 4 }
 0x601   :  { %v1709_v37 = vpop.f32.mrf.mxu0 }
 0x602   :  { %v1803_v51 = vadd.f32 %v1787_v42, %v4618_v43  ;;  %v1807_v57 = vadd.f32 %v1791_v55, %v4619_v39  ;;  %v1788_v15 = vrot.slane %v1709_v37, 3  ;;  %v1792_v33 = vrot.slane %v1709_v37, 4  ;;  %v1780_v42 = vpop.f32.mrf.mxu1  ;;  %v4621_v39 = vld [vmem:[#allocation40_spill] sm:$0xff] }
 0x603   :  { %v1805_v55 = vadd.f32 %v1789_v20, %v3601_v21  ;;  %v1809_v37 = vadd.f32 %v1793_v63, %v4621_v39 }
 0x604   :  { %v2743_v41 = vmul.f32 -1.442695, %v1803_v51  ;;  %v2746_v35 = vmul.f32 -1.442695, %v1807_v57  ;;  %v1804_v45 = vadd.f32 %v1788_v15, %v4620_v49  ;;  %v1808_v47 = vadd.f32 %v1792_v33, %v3596_v36  ;;  %v4622_v15 = vld [vmem:[#allocation41_spill] sm:$0xff] }
 0x605   :  { %v1790_v51 = vrot.slane %v1780_v42, 3  ;;  %v1794_v57 = vrot.slane %v1780_v42, 4  ;;  %v2745_v43 = vmul.f32 -1.442695, %v1805_v55  ;;  %v2748_v52 = vmul.f32 -1.442695, %v1809_v37 }
 0x606   :  { %3032 = vpow2.f32 %v2743_v41  ;;  %v2744_v59 = vmul.f32 -1.442695, %v1804_v45  ;;  %v2747_v62 = vmul.f32 -1.442695, %v1808_v47  ;;  %v4623_v41 = vld [vmem:[#allocation42_spill] sm:$0xff] }
 0x607   :  { %3034 = vpow2.f32 %v2746_v35  ;;  %v1806_v49 = vadd.f32 %v1790_v51, %v4622_v15  ;;  %v1810_v35 = vadd.f32 %v1794_v57, %v4623_v41 }
 0x608   :  { %3036 = vpow2.f32 %v2744_v59 }
 0x609   :  { %3038 = vpow2.f32 %v2747_v62 }
 0x60a   :  { %3040 = vpow2.f32 %v2745_v43  ;;  %v1851_v43 = vrot.slane %v4073_v53, 7 }
 0x60b   :  { %3042 = vpow2.f32 %v2748_v52 }
 0x60c   :  { %3044 = vtanh.f32 %v1806_v49  ;;  %v1852_v49 = vrot.slane %v4075_v61, 7 }
 0x60d   :  { %3046 = vtanh.f32 %v1810_v35 }
 0x613   :  { %v3033_v33 = vpop.eup %3032 }
 0x614   :  { %v3035_v45 = vpop.eup %3034  ;;  %v1829_v47 = vadd.f32 1.0, %v3033_v33 }
 0x615   :  { %v1832_v34 = vadd.f32 1.0, %v3035_v45  ;;  %v3037_v59 = vpop.eup %3036 }
 0x616   :  { %v3039_v20 = vpop.eup %3038  ;;  %3048 = vrcp.f32 %v1829_v47  ;;  %v1830_v62 = vadd.f32 1.0, %v3037_v59 }
 0x617   :  { %3050 = vrcp.f32 %v1832_v34  ;;  %v1833_v63 = vadd.f32 1.0, %v3039_v20  ;;  %v3041_v42 = vpop.eup %3040 }
 0x618   :  { %3052 = vrcp.f32 %v1830_v62  ;;  %v3043_v55 = vpop.eup %3042  ;;  %v1831_v33 = vadd.f32 1.0, %v3041_v42 }
 0x619   :  { %3054 = vrcp.f32 %v1833_v63  ;;  %v3045_v37 = vpop.eup %3044  ;;  %v1834_v35 = vadd.f32 1.0, %v3043_v55 }
 0x61a   :  { %v3047_v51 = vpop.eup %3046  ;;  %3056 = vrcp.f32 %v1831_v33 }
 0x61b   :  { %3058 = vrcp.f32 %v1834_v35 }
 0x623   :  { %v3049_v57 = vpop.eup %3048 }
 0x624   :  { %v3051_v41 = vpop.eup %3050  ;;  %v1857_v59 = vmul.f32 %v3049_v57, %v3045_v37 }
 0x625   :  { %v3053_v52 = vpop.eup %3052  ;;  %v1858_v20 = vmul.f32 %v3051_v41, %v3047_v51 }
 0x626   :  { %v3055_v45 = vpop.eup %3054  ;;  %v1855_v47 = vmul.f32 %v3053_v52, %v1851_v43  ;;  %v4650_v52 = vld [vmem:[#allocation40_spill] sm:$0xff] }
 0x627   :  { %v1856_v34 = vmul.f32 %v3055_v45, %v1852_v49  ;;  %v3057_v53 = vpop.eup %3056 }
 0x628   :  { %v4156_v62 = vadd.f32 %v1857_v59, %v1855_v47  ;;  %v3059_v42 = vpop.eup %3058 }
 0x629   :  { %v4158_v63 = vadd.f32 %v1858_v20, %v1856_v34  ;;  %v4651_v34 = vld [vmem:[#allocation41_spill] sm:$0xff] }
 0x62a   :  { %3060 = vtanh.f32 %v4156_v62 }
 0x62b   :  { %3062 = vtanh.f32 %v4158_v63 }
 0x637   :  { %v3061_v15 = vpop.eup %3060 }
 0x638   :  { %v3063_v61 = vpop.eup %3062  ;;  %v1863_v55 = vmul.f32 %v3061_v15, %v3057_v53 }
 0x639   :  { %v1864_v39 = vmul.f32 %v3063_v61, %v3059_v42  ;;  %v4652_v42 = vld [vmem:[#allocation42_spill] sm:$0xff] }
 0x63a   :  { %v1867_v43 = vrot.slane %v1863_v55, 5 }
 0x63b   :  { %v1868_v37 = vrot.slane %v1864_v39, 4 }
 0x63d   :  { %v1869_v41 = vsel %vm723_vm4, %v1868_v37, %v1867_v43 }
 0x63e   :  { %1936 = vmatmul.mubr.f32.vlgmr.msra.gmra.mxu0 %v1869_v41  ;;  %2007 = vmatmul.mubr.f32.vlgmr.msra.gmra.mxu1 %v1869_v41 }
 0x63f   :  { %2102 = vmatpush1.msra.mxu0 %v3788_v2  ;;  %2173 = vmatpush1.msra.mxu1 %v3791_v23  ;;  %v4624_v2 = vld [vmem:[#allocation12_spill] sm:$0xff] }
 0x640   :  { %2103 = vmatprep.subr.mxu0 %v3794_v44  ;;  %2174 = vmatprep.subr.mxu1 %v3797_v50  ;;  %v4625_v23 = vld [vmem:[#allocation8_spill] sm:$0xff]  ;;  %v4626_v44 = vld [vmem:[#allocation25_spill] sm:$0xff] }
 0x641   :  { %2104 = vmatpush1.msra.mxu0 %v3800_v60  ;;  %2175 = vmatpush1.msra.mxu1 %v3803_v56  ;;  %v4627_v50 = vld [vmem:[#allocation13_spill] sm:$0xff]  ;;  %v4628_v60 = vld [vmem:[#allocation26_spill] sm:$0xff] }
 0x642   :  { %2105 = vmatprep.subr.mxu0 %v3806_v0  ;;  %2176 = vmatprep.subr.mxu1 %v3809_v1  ;;  %v4629_v56 = vld [vmem:[#allocation14_spill] sm:$0xff]  ;;  %v4630_v0 = vld [vmem:[#allocation27_spill] sm:$0xff] }
 0x643   :  { %2106 = vmatpush1.msra.mxu0 %v3812_v58  ;;  %2177 = vmatpush1.msra.mxu1 %v3815_v40  ;;  %v4631_v1 = vld [vmem:[#allocation15_spill] sm:$0xff]  ;;  %v4632_v58 = vld [vmem:[#allocation28_spill] sm:$0xff] }
 0x644   :  { %2107 = vmatprep.subr.mxu0 %v3818_v3  ;;  %2178 = vmatprep.subr.mxu1 %v3821_v13  ;;  %v4633_v40 = vld [vmem:[#allocation16_spill] sm:$0xff]  ;;  %v4634_v3 = vld [vmem:[#allocation29_spill] sm:$0xff] }
 0x645   :  { %2108 = vmatpush1.msra.mxu0 %v3824_v38  ;;  %2179 = vmatpush1.msra.mxu1 %v3827_v7  ;;  %v4635_v13 = vld [vmem:[#allocation17_spill] sm:$0xff]  ;;  %v4636_v38 = vld [vmem:[#allocation30_spill] sm:$0xff] }
 0x646   :  { %2109 = vmatprep.subr.mxu0 %v3830_v5  ;;  %2180 = vmatprep.subr.mxu1 %v3833_v4  ;;  %v4637_v7 = vld [vmem:[#allocation18_spill] sm:$0xff]  ;;  %v4638_v5 = vld [vmem:[#allocation31_spill] sm:$0xff] }
 0x647   :  { %2110 = vmatpush1.msra.mxu0 %v3836_v17  ;;  %2181 = vmatpush1.msra.mxu1 %v3839_v46  ;;  %v4639_v4 = vld [vmem:[#allocation19_spill] sm:$0xff]  ;;  %v4640_v17 = vld [vmem:[#allocation32_spill] sm:$0xff] }
 0x648   :  { %2111 = vmatprep.subr.mxu0 %v3842_v11  ;;  %2182 = vmatprep.subr.mxu1 %v3845_v6  ;;  %v4641_v46 = vld [vmem:[#allocation20_spill] sm:$0xff]  ;;  %v4642_v11 = vld [vmem:[#allocation33_spill] sm:$0xff] }
 0x649   :  { %2112 = vmatpush1.msra.mxu0 %v3848_v9  ;;  %2183 = vmatpush1.msra.mxu1 %v3851_v8  ;;  %v4643_v6 = vld [vmem:[#allocation21_spill] sm:$0xff]  ;;  %v4644_v9 = vld [vmem:[#allocation34_spill] sm:$0xff]  ;;  %v4645_v8 = vmov 0.0  }
 0x64a   :  { %2113 = vmatprep.subr.mxu0 %v3854_v10  ;;  %2184 = vmatprep.subr.mxu1 %v3857_v12  ;;  %v4646_v10 = vld [vmem:[#allocation22_spill] sm:$0xff] }
 0x64b   :  { %2114 = vmatpush1.msra.mxu0 %v3860_v14  ;;  %2185 = vmatpush1.msra.mxu1 %v3863_v16 }
 0x64c   :  { %2115 = vmatprep.subr.mxu0 %v3866_v18  ;;  %2186 = vmatprep.subr.mxu1 %v3869_v19  ;;  %v4647_v19 = vld [vmem:[#allocation37_spill] sm:$0xff] }
 0x64d   :  { %2116 = vmatpush1.msra.mxu0 %v3872_v22  ;;  %2187 = vmatpush1.msra.mxu1 %v3875_v24  ;;  %v4648_v24 = vld [vmem:[#allocation39_spill] sm:$0xff] }
 0x64e   :  { %2117 = vmatprep.subr.mxu0 %v3878_v25  ;;  %2188 = vmatprep.subr.mxu1 %v3881_v26 }
 0x64f   :  { %2118 = vmatpush1.msra.mxu0 %v3884_v27  ;;  %2189 = vmatpush1.msra.mxu1 %v3887_v28 }
 0x650   :  { %2119 = vmatprep.subr.mxu0 %v3890_v29  ;;  %2190 = vmatprep.subr.mxu1 %v3893_v30 }
 0x651   :  { %2120 = vmatpush1.msra.mxu0 %v3896_v31  ;;  %2191 = vmatpush1.msra.mxu1 %v3899_v32  ;;  %v4649_v31 = vld [vmem:[#allocation38_spill] sm:$0xff] }
 0x652   :  { %2121 = vmatprep.subr.mxu0 %v4562_v48  ;;  %2192 = vmatprep.subr.mxu1 %v4563_v54 }
 0x653   :  { %2122 = vmatpush1.msra.mxu0 %v4624_v2  ;;  %2193 = vmatpush1.msra.mxu1 %v4625_v23 }
 0x654   :  { %2123 = vmatprep.subr.mxu0 %v4626_v44  ;;  %2194 = vmatprep.subr.mxu1 %v4627_v50 }
 0x655   :  { %2124 = vmatpush1.msra.mxu0 %v4628_v60  ;;  %2195 = vmatpush1.msra.mxu1 %v4629_v56 }
 0x656   :  { %2125 = vmatprep.subr.mxu0 %v4630_v0  ;;  %2196 = vmatprep.subr.mxu1 %v4631_v1 }
 0x657   :  { %2126 = vmatpush1.msra.mxu0 %v4632_v58  ;;  %2197 = vmatpush1.msra.mxu1 %v4633_v40  ;;  %v2081_v40 = vrot.slane %v4156_v62, 7 }
 0x658   :  { %2127 = vmatprep.subr.mxu0 %v4634_v3  ;;  %2198 = vmatprep.subr.mxu1 %v4635_v13 }
 0x659   :  { %2128 = vmatpush1.msra.mxu0 %v4636_v38  ;;  %2199 = vmatpush1.msra.mxu1 %v4637_v7  ;;  %v2082_v38 = vrot.slane %v4158_v63, 7 }
 0x65a   :  { %2129 = vmatprep.subr.mxu0 %v4638_v5  ;;  %2200 = vmatprep.subr.mxu1 %v4639_v4 }
 0x65b   :  { %2130 = vmatpush1.msra.mxu0 %v4640_v17  ;;  %2201 = vmatpush1.msra.mxu1 %v4641_v46 }
 0x65c   :  { %2131 = vmatprep.subr.mxu0 %v4642_v11  ;;  %2202 = vmatprep.subr.mxu1 %v4643_v6 }
 0x65d   :  { %2132 = vmatpush1.msra.mxu0 %v4644_v9  ;;  %2165 = vmatprep.mubr.f32.mxu0 %v4645_v8 }
 0x65e   :  { %2203 = vmatpush1.msra.mxu1 %v4646_v10  ;;  %2236 = vmatprep.mubr.f32.mxu1 %v4645_v8 }
 0x65f   :  { %2800 = vmatprep.subr.mxu0 %v4645_v8  ;;  %2805 = vmatprep.subr.mxu1 %v4645_v8 }
 0x6fe   :  { %v1937_v12 = vpop.f32.mrf.mxu0  ;;  %v2008_v30 = vpop.f32.mrf.mxu1 }
 0x6ff   :  { %v2017_v14 = vrot.slane %v1937_v12, 2  ;;  %v2021_v16 = vrot.slane %v1937_v12, 3  ;;  %v2019_v15 = vrot.slane %v2008_v30, 2  ;;  %v2023_v51 = vrot.slane %v2008_v30, 3  ;;  %v2344_v30 = vld [vmem:[#allocation4 + $0x88] sm:$0xff] }
 0x700   :  { %v1939_v18 = vpop.f32.mrf.mxu0  ;;  %v2010_v57 = vpop.f32.mrf.mxu1 }
 0x701   :  { %v2033_v22 = vadd.f32 %v2017_v14, %v4647_v19  ;;  %v2037_v25 = vadd.f32 %v2021_v16, %v4648_v24  ;;  %v2018_v26 = vrot.slane %v1939_v18, 2  ;;  %v2022_v27 = vrot.slane %v1939_v18, 3 }
 0x702   :  { %v2035_v33 = vadd.f32 %v2019_v15, %v3601_v21  ;;  %v2039_v49 = vadd.f32 %v2023_v51, %v4650_v52  ;;  %v2020_v35 = vrot.slane %v2010_v57, 2  ;;  %v2024_v45 = vrot.slane %v2010_v57, 3  ;;  %v2339_v15 = vld [vmem:[#allocation4 + $0x60] sm:$0xff]  ;;  %v2338_v51 = vld [vmem:[#allocation4 + $0x58] sm:$0xff]  ;;  %v2337_v57 = vld [vmem:[#allocation4 + $0x50] sm:$0xff] }
 0x703   :  { %v2749_v28 = vmul.f32 -1.442695, %v2033_v22  ;;  %v2752_v29 = vmul.f32 -1.442695, %v2037_v25  ;;  %v2034_v32 = vadd.f32 %v2018_v26, %v4649_v31  ;;  %v2038_v48 = vadd.f32 %v2022_v27, %v3596_v36  ;;  %v2328_v26 = vld [vmem:[#allocation4 + $0x8] sm:$0x7] }
 0x704   :  { %v2751_v47 = vmul.f32 -1.442695, %v2035_v33  ;;  %v2754_v59 = vmul.f32 -1.442695, %v2039_v49  ;;  %v2036_v20 = vadd.f32 %v2020_v35, %v4651_v34  ;;  %v2040_v61 = vadd.f32 %v2024_v45, %v4652_v42  ;;  %v2326_v27 = vld [vmem:[%s4299_s1] sm:$0x3] }
 0x705   :  { %3064 = vpow2.f32 %v2749_v28  ;;  %v2750_v54 = vmul.f32 -1.442695, %v2034_v32  ;;  %v2753_v39 = vmul.f32 -1.442695, %v2038_v48  ;;  %v2327_v28 = vld [vmem:[#allocation4] sm:$0x3f] }
 0x706   :  { %3066 = vpow2.f32 %v2752_v29  ;;  %v2325_v29 = vld [vmem:[%s4298_s0] sm:$0x3]  ;;  %v2342_v48 = vld [vmem:[#allocation4 + $0x78] sm:$0xff]  ;;  %v2336_v33 = vld [vmem:[#allocation4 + $0x48] sm:$0xff] }
 0x707   :  { %3068 = vpow2.f32 %v2750_v54  ;;  %v2343_v32 = vld [vmem:[#allocation4 + $0x80] sm:$0xff]  ;;  %v2341_v54 = vld [vmem:[#allocation4 + $0x70] sm:$0xff]  ;;  %v2334_v35 = vld [vmem:[#allocation4 + $0x38] sm:$0xff] }
 0x708   :  { %3070 = vpow2.f32 %v2753_v39  ;;  %v2340_v39 = vld [vmem:[#allocation4 + $0x68] sm:$0xff]  ;;  %v2335_v49 = vld [vmem:[#allocation4 + $0x40] sm:$0xff]  ;;  %v2333_v45 = vld [vmem:[#allocation4 + $0x30] sm:$0xff] }
 0x709   :  { %3072 = vpow2.f32 %v2751_v47  ;;  %v2332_v47 = vld [vmem:[#allocation4 + $0x28] sm:$0xff] }
 0x70a   :  { %3074 = vpow2.f32 %v2754_v59  ;;  %v2331_v59 = vld [vmem:[#allocation4 + $0x20] sm:$0xff] }
 0x70b   :  { %3076 = vtanh.f32 %v2036_v20  ;;  %v2330_v20 = vld [vmem:[#allocation4 + $0x18] sm:$0xff] }
 0x70c   :  { %3078 = vtanh.f32 %v2040_v61  ;;  %v2353_v61 = vld [vmem:[#allocation4 + $0xd0] sm:$0xff] }
 0x712   :  { %v3065_v53 = vpop.eup %3064 }
 0x713   :  { %v3067_v55 = vpop.eup %3066  ;;  %v2059_v43 = vadd.f32 1.0, %v3065_v53  ;;  %v2329_v53 = vld [vmem:[#allocation4 + $0x10] sm:$0xff] }
 0x714   :  { %v2062_v37 = vadd.f32 1.0, %v3067_v55  ;;  %v3069_v41 = vpop.eup %3068  ;;  %v2352_v55 = vld [vmem:[#allocation4 + $0xc8] sm:$0xff] }
 0x715   :  { %v3071_v2 = vpop.eup %3070  ;;  %3080 = vrcp.f32 %v2059_v43  ;;  %v2060_v23 = vadd.f32 1.0, %v3069_v41  ;;  %v2351_v43 = vld [vmem:[#allocation4 + $0xc0] sm:$0xff] }
 0x716   :  { %3082 = vrcp.f32 %v2062_v37  ;;  %v2063_v44 = vadd.f32 1.0, %v3071_v2  ;;  %v3073_v50 = vpop.eup %3072  ;;  %v2350_v37 = vld [vmem:[#allocation4 + $0xb8] sm:$0xff] }
 0x717   :  { %3084 = vrcp.f32 %v2060_v23  ;;  %v3075_v60 = vpop.eup %3074  ;;  %v2061_v3 = vadd.f32 1.0, %v3073_v50 }
 0x718   :  { %3086 = vrcp.f32 %v2063_v44  ;;  %v3077_v56 = vpop.eup %3076  ;;  %v2064_v7 = vadd.f32 1.0, %v3075_v60 }
 0x719   :  { %v3079_v0 = vpop.eup %3078  ;;  %3088 = vrcp.f32 %v2061_v3 }
 0x71a   :  { %3090 = vrcp.f32 %v2064_v7 }
 0x722   :  { %v3081_v1 = vpop.eup %3080 }
 0x723   :  { %v3083_v58 = vpop.eup %3082  ;;  %v2087_v17 = vmul.f32 %v3081_v1, %v3077_v56 }
 0x724   :  { %v3085_v13 = vpop.eup %3084  ;;  %v2088_v11 = vmul.f32 %v3083_v58, %v3079_v0 }
 0x725   :  { %v3087_v5 = vpop.eup %3086  ;;  %v2085_v4 = vmul.f32 %v3085_v13, %v2081_v40 }
 0x726   :  { %v2086_v46 = vmul.f32 %v3087_v5, %v2082_v38  ;;  %v3089_v62 = vpop.eup %3088 }
 0x727   :  { %v4239_v6 = vadd.f32 %v2087_v17, %v2085_v4  ;;  %v3091_v10 = vpop.eup %3090 }
 0x728   :  { %v4241_v9 = vadd.f32 %v2088_v11, %v2086_v46 }
 0x729   :  { %3092 = vtanh.f32 %v4239_v6 }
 0x72a   :  { %3094 = vtanh.f32 %v4241_v9 }
 0x736   :  { %v3093_v12 = vpop.eup %3092 }
 0x737   :  { %v3095_v63 = vpop.eup %3094  ;;  %v2093_v14 = vmul.f32 %v3093_v12, %v3089_v62 }
 0x738   :  { %v2094_v16 = vmul.f32 %v3095_v63, %v3091_v10 }
 0x739   :  { %v2097_v18 = vrot.slane %v2093_v14, 6 }
 0x73a   :  { %v2098_v22 = vrot.slane %v2094_v16, 5 }
 0x73c   :  { %v2099_v25 = vsel %vm723_vm4, %v2098_v22, %v2097_v18 }
 0x73d   :  { %2166 = vmatmul.mubr.f32.vlgmr.msra.gmra.mxu0 %v2099_v25  ;;  %2237 = vmatmul.mubr.f32.vlgmr.msra.gmra.mxu1 %v2099_v25 }
 0x73e   :  { %2801 = vmatpush3.msk.msra.mxu0 %vm2361_vm5, %v2328_v26  ;;  %2802 = vmatprep.mubr.msk.f32.mxu0 %vm3243_vm6, %v4645_v8 }
 0x73f   :  { %2807 = vmatprep.mubr.msk.f32.mxu1 %vm3243_vm6, %v4645_v8  ;;  %2806 = vmatpush3.msk.msra.mxu1 %vm2439_vm8, %v2327_v28 }
 0x740   :  { %2810 = vmatprep.subr.mxu0 %v4645_v8  ;;  %2845 = vmatprep.subr.mxu1 %v4645_v8 }
 0x741   :  { %2803 = vmatmul.mubr.msk.f32.vlgmr.msra.gmra.mxu0 %vm2357_vm7, %v2326_v27  ;;  %2808 = vmatmul.mubr.msk.f32.vlgmr.msra.gmra.mxu1 %vm2435_vm9, %v2325_v29  ;;  %v2311_v29 = vrot.slane %v4239_v6, 7 }
 0x742   :  { %2811 = vmatpush3.msra.mxu0 %v2344_v30  ;;  %2842 = vmatprep.mubr.msk.f32.mxu0 %vm3243_vm6, %v4645_v8 }
 0x743   :  { %2812 = vmatprep.subr.mxu0 %v4645_v8  ;;  %2861 = vmatprep.mubr.msk.f32.mxu1 %vm3243_vm6, %v4645_v8 }
 0x744   :  { %2813 = vmatpush3.msra.mxu0 %v2343_v32  ;;  %2846 = vmatpush3.msra.mxu1 %v2353_v61 }
 0x745   :  { %2814 = vmatprep.subr.mxu0 %v4645_v8  ;;  %2847 = vmatprep.subr.mxu1 %v4645_v8 }
 0x746   :  { %2815 = vmatpush3.msra.mxu0 %v2342_v48  ;;  %2848 = vmatpush3.msra.mxu1 %v2352_v55  ;;  %v2312_v48 = vrot.slane %v4241_v9, 7 }
 0x747   :  { %2816 = vmatprep.subr.mxu0 %v4645_v8  ;;  %2849 = vmatprep.subr.mxu1 %v4645_v8 }
 0x748   :  { %2817 = vmatpush3.msra.mxu0 %v2341_v54  ;;  %2850 = vmatpush3.msra.mxu1 %v2351_v43 }
 0x749   :  { %2818 = vmatprep.subr.mxu0 %v4645_v8  ;;  %2851 = vmatprep.subr.mxu1 %v4645_v8 }
 0x74a   :  { %2819 = vmatpush3.msra.mxu0 %v2340_v39  ;;  %2852 = vmatpush3.msra.mxu1 %v2350_v37 }
 0x74b   :  { %2820 = vmatprep.subr.mxu0 %v4645_v8  ;;  %2853 = vmatprep.subr.mxu1 %v4645_v8 }
 0x74c   :  { %2821 = vmatpush3.msra.mxu0 %v2339_v15 }
 0x74d   :  { %2822 = vmatprep.subr.mxu0 %v4645_v8 }
 0x74e   :  { %2823 = vmatpush3.msra.mxu0 %v2338_v51 }
 0x74f   :  { %2824 = vmatprep.subr.mxu0 %v4645_v8 }
 0x750   :  { %2825 = vmatpush3.msra.mxu0 %v2337_v57 }
 0x751   :  { %2826 = vmatprep.subr.mxu0 %v4645_v8 }
 0x752   :  { %2827 = vmatpush3.msra.mxu0 %v2336_v33 }
 0x753   :  { %2828 = vmatprep.subr.mxu0 %v4645_v8 }
 0x754   :  { %2829 = vmatpush3.msra.mxu0 %v2335_v49 }
 0x755   :  { %2830 = vmatprep.subr.mxu0 %v4645_v8 }
 0x756   :  { %2831 = vmatpush3.msra.mxu0 %v2334_v35 }
 0x757   :  { %2832 = vmatprep.subr.mxu0 %v4645_v8 }
 0x758   :  { %2833 = vmatpush3.msra.mxu0 %v2333_v45 }
 0x759   :  { %2834 = vmatprep.subr.mxu0 %v4645_v8 }
 0x75a   :  { %2835 = vmatpush3.msra.mxu0 %v2332_v47 }
 0x75b   :  { %2836 = vmatprep.subr.mxu0 %v4645_v8 }
 0x75c   :  { %2837 = vmatpush3.msra.mxu0 %v2331_v59 }
 0x75d   :  { %2838 = vmatprep.subr.mxu0 %v4645_v8 }
 0x75e   :  { %2839 = vmatpush3.msra.mxu0 %v2330_v20 }
 0x75f   :  { %2840 = vmatprep.subr.mxu0 %v4645_v8 }
 0x760   :  { %2841 = vmatpush3.msra.mxu0 %v2329_v53 }
 0x7fd   :  { %v2167_v41 = vpop.f32.mrf.mxu0  ;;  %v2238_v40 = vpop.f32.mrf.mxu1 }
 0x7fe   :  { %v2247_v2 = vrot.slane %v2167_v41, 1  ;;  %v2251_v23 = vrot.slane %v2167_v41, 2  ;;  %v2249_v5 = vrot.slane %v2238_v40, 1  ;;  %v2253_v4 = vrot.slane %v2238_v40, 2 }
 0x7ff   :  { %v2169_v44 = vpop.f32.mrf.mxu0 }
 0x800   :  { %v2263_v50 = vadd.f32 %v2247_v2, %v4647_v19  ;;  %v2267_v60 = vadd.f32 %v2251_v23, %v4648_v24  ;;  %v2248_v56 = vrot.slane %v2169_v44, 1  ;;  %v2252_v0 = vrot.slane %v2169_v44, 2  ;;  %v2240_v19 = vpop.f32.mrf.mxu1  ;;  %v2349_v44 = vld [vmem:[#allocation4 + $0xb0] sm:$0xff] }
 0x801   :  { %v2265_v24 = vadd.f32 %v2249_v5, %v3601_v21  ;;  %v2269_v17 = vadd.f32 %v2253_v4, %v4650_v52  ;;  %v2250_v46 = vrot.slane %v2240_v19, 1  ;;  %v2254_v11 = vrot.slane %v2240_v19, 2  ;;  %v2431_v43 = vpop.f32.mrf.mxu0  ;;  %2854 = vmatpush3.msra.mxu1 %v2349_v44  ;;  %v2768_v19 = vld [vmem:[#allocation4 + $0xe0] ss:$0 sm:$0xff] }
 0x802   :  { %v2755_v1 = vmul.f32 -1.442695, %v2263_v50  ;;  %v2758_v58 = vmul.f32 -1.442695, %v2267_v60  ;;  %v2264_v3 = vadd.f32 %v2248_v56, %v4649_v31  ;;  %v2268_v13 = vadd.f32 %v2252_v0, %v3596_v36  ;;  %v2509_v41 = vpop.f32.mrf.mxu1  ;;  %2855 = vmatprep.subr.mxu1 %v4645_v8  ;;  %v2348_v50 = vld [vmem:[#allocation4 + $0xa8] sm:$0xff]  ;;  %v2347_v60 = vld [vmem:[#allocation4 + $0xa0] sm:$0xff] }
 0x803   :  { %v2757_v62 = vmul.f32 -1.442695, %v2265_v24  ;;  %v2760_v10 = vmul.f32 -1.442695, %v2269_v17  ;;  %v2266_v31 = vadd.f32 %v2250_v46, %v4651_v34  ;;  %v2270_v12 = vadd.f32 %v2254_v11, %v4652_v42  ;;  %v2804_v37 = vpop.f32.mrf.mxu0  ;;  %2856 = vmatpush3.msra.mxu1 %v2348_v50  ;;  %v2346_v56 = vld [vmem:[#allocation4 + $0x98] sm:$0xff] }
 0x804   :  { %3096 = vpow2.f32 %v2755_v1  ;;  %v2756_v38 = vmul.f32 -1.442695, %v2264_v3  ;;  %v2759_v7 = vmul.f32 -1.442695, %v2268_v13  ;;  %v2510_v2 = vadd.f32 %v2509_v41, %v2431_v43  ;;  %v2809_v23 = vpop.f32.mrf.mxu1  ;;  %2857 = vmatprep.subr.mxu1 %v4645_v8  ;;  %v2765_v0 = vld [vmem:[#allocation4 + $0x90] ss:$0 sm:$0xff] }
 0x805   :  { %3098 = vpow2.f32 %v2758_v58  ;;  %2858 = vmatpush3.msra.mxu1 %v2347_v60 }
 0x806   :  { %3100 = vpow2.f32 %v2756_v38  ;;  %2859 = vmatprep.subr.mxu1 %v4645_v8  ;;  %v2766_v38 = vld [vmem:[#allocation4 + $0xd8] ss:$0 sm:$0xff]  ;;  %v2769_v8 = vld [vmem:[#allocation4 + $0xe8] ss:$0 sm:$0xff] }
 0x807   :  { %3102 = vpow2.f32 %v2759_v7  ;;  %2860 = vmatpush3.msra.mxu1 %v2346_v56 }
 0x808   :  { %3104 = vpow2.f32 %v2757_v62 }
 0x809   :  { %3106 = vpow2.f32 %v2760_v10 }
 0x80a   :  { %3108 = vtanh.f32 %v2266_v31 }
 0x80b   :  { %3110 = vtanh.f32 %v2270_v12 }
 0x811   :  { %v3097_v36 = vpop.eup %3096 }
 0x812   :  { %v3099_v63 = vpop.eup %3098  ;;  %v2289_v14 = vadd.f32 1.0, %v3097_v36 }
 0x813   :  { %v2292_v16 = vadd.f32 1.0, %v3099_v63  ;;  %v3101_v18 = vpop.eup %3100 }
 0x814   :  { %v3103_v21 = vpop.eup %3102  ;;  %3112 = vrcp.f32 %v2289_v14  ;;  %v2290_v52 = vadd.f32 1.0, %v3101_v18 }
 0x815   :  { %3114 = vrcp.f32 %v2292_v16  ;;  %v2293_v22 = vadd.f32 1.0, %v3103_v21  ;;  %v3105_v25 = vpop.eup %3104 }
 0x816   :  { %3116 = vrcp.f32 %v2290_v52  ;;  %v3107_v34 = vpop.eup %3106  ;;  %v2291_v30 = vadd.f32 1.0, %v3105_v25 }
 0x817   :  { %3118 = vrcp.f32 %v2293_v22  ;;  %v3109_v26 = vpop.eup %3108  ;;  %v2294_v54 = vadd.f32 1.0, %v3107_v34 }
 0x818   :  { %v3111_v27 = vpop.eup %3110  ;;  %3120 = vrcp.f32 %v2291_v30 }
 0x819   :  { %3122 = vrcp.f32 %v2294_v54 }
 0x821   :  { %v3113_v42 = vpop.eup %3112 }
 0x822   :  { %v3115_v28 = vpop.eup %3114  ;;  %v2317_v51 = vmul.f32 %v3113_v42, %v3109_v26 }
 0x823   :  { %v3117_v32 = vpop.eup %3116  ;;  %v2318_v33 = vmul.f32 %v3115_v28, %v3111_v27 }
 0x824   :  { %v3119_v39 = vpop.eup %3118  ;;  %v2315_v15 = vmul.f32 %v3117_v32, %v2311_v29 }
 0x825   :  { %v2316_v57 = vmul.f32 %v3119_v39, %v2312_v48  ;;  %v3121_v45 = vpop.eup %3120 }
 0x826   :  { %v2319_v49 = vadd.f32 %v2317_v51, %v2315_v15  ;;  %v3123_v47 = vpop.eup %3122 }
 0x827   :  { %v2320_v35 = vadd.f32 %v2318_v33, %v2316_v57 }
 0x828   :  { %3124 = vtanh.f32 %v2319_v49 }
 0x829   :  { %3126 = vtanh.f32 %v2320_v35 }
 0x835   :  { %v3125_v59 = vpop.eup %3124 }
 0x836   :  { %v3127_v6 = vpop.eup %3126  ;;  %v2323_v20 = vmul.f32 %v3125_v59, %v3121_v45 }
 0x837   :  { %v2324_v53 = vmul.f32 %v3127_v6, %v3123_v47 }
 0x838   :  { %v2515_v61 = vrot.slane %v2323_v20, 7 }
 0x839   :  { %v2516_v9 = vrot.slane %v2324_v53, 6 }
 0x83b   :  { %v2517_v55 = vsel %vm723_vm4, %v2516_v9, %v2515_v61 }
 0x83c   :  { %2843 = vmatmul.mubr.f32.vlgmr.msra.gmra.mxu0 %v2517_v55 }
 0x8fc   :  { %v2585_v1 = vpop.f32.mrf.mxu0 }
 0x8fd   :  { %v2589_v58 = vadd.f32 %v2585_v1, %v2510_v2 }
 0x8fe   :  { %v2844_v40 = vpop.f32.mrf.mxu0 }
 0x8ff   :  { %v2594_v3 = vadd.f32 %v2765_v0, %v2589_v58 }
 0x901   :  { %v2595_v13 = vmax.f32 %v2594_v3, 0.0 }
 0x903   :  { %2862 = vmatmul.mubr.msk.f32.vlgmr.msra.gmra.mxu1 %vm2600_vm10, %v2595_v13 }
 0x9c3   :  { %v2670_v7 = vpop.f32.mrf.mxu1 }
 0x9c4   :  { %v2671_v5 = vadd.f32 %v2766_v38, %v2670_v7 }
 0x9c5   :  { %v2863_v4 = vpop.f32.mrf.mxu1 }
 0x9c6   :  { %v2674_v24 = vmax.f32 %v2671_v5, 0.0 }
 0x9c8   :  { %v2679_v17 = vmul.f32 %v2768_v19, %v2674_v24 }
 0x9ca   :  { %v2681_v46 = vsel %vm2680_vm11, %v2679_v17, 0.0 }
 0x9cb   :  { %2682 = vadd.xlane.f32.xlu0 %v2681_v46 }
 0xa54   :  { %v2683_v11 = vpop.xlane.xlu0 %2682 }
 0xa55   :  { %v2688_v62 = vadd.f32 %v2769_v8, %v2683_v11 }
 0xa57   :  { %2690 = vst.msk [vmem:[%s4304_s6] sm:$0x3] %vm2689_vm12, %v2688_v62 }
 0xa58   :  { %2695 = vsyncpa [#allocation3], 1 }
 0xa59   :  { %2696 = vsyncpa [#allocation5], 1 }

</bundles_post_ra>
